<compile_context>
chip_gen: v5e
topology: v5e:2x2
jax: 0.10.0
libtpu: 0.0.40
codegen_flags: <defaults>
</compile_context>

<pallas_src>
import jax
import jax.numpy as jnp
from jax.experimental import pallas as pl
from jax.experimental.pallas import tpu as pltpu


def _round_up(n, m):
    return ((n + m - 1) // m) * m


def _leaky_relu(v, slope=0.2):
    return jnp.where(v > 0, v, slope * v)


def discriminator_kernel(x_ref,
                         w1_ref, b1_ref,
                         w2_ref, b2_ref,
                         w3_ref, b3_ref,
                         w4_ref, b4_ref,
                         o_ref):
    # MXU matmuls: bf16 inputs, f32 accumulation.  Bias + LeakyReLU in f32 (VPU).
    h = jnp.dot(x_ref[...], w1_ref[...], preferred_element_type=jnp.float32)
    h = _leaky_relu(h + b1_ref[...])

    h = jnp.dot(h.astype(jnp.bfloat16), w2_ref[...],
                preferred_element_type=jnp.float32)
    h = _leaky_relu(h + b2_ref[...])

    h = jnp.dot(h.astype(jnp.bfloat16), w3_ref[...],
                preferred_element_type=jnp.float32)
    h = _leaky_relu(h + b3_ref[...])

    # Final layer: lane-dense 128-wide output block (only column 0 is real).
    h = jnp.dot(h.astype(jnp.bfloat16), w4_ref[...],
                preferred_element_type=jnp.float32)
    o_ref[...] = h + b4_ref[...]


def discriminator_forward(x, params, *, tile_b=256):
    """x: (B, im_dim) f32.  params: list of (W_t, b), W_t (in, out) f32, b (1, out) f32."""
    (w1, b1), (w2, b2), (w3, b3), (w4, b4) = params
    B, im_dim = x.shape
    d1, d2, d3 = w1.shape[1], w2.shape[1], w3.shape[1]
    out_dim = w4.shape[1]

    # --- Alignment / padding ---------------------------------------------
    k1 = _round_up(im_dim, 128)                 # 784 -> 896 (7 * 128)
    n4 = 128                                    # lane-dense final block width
    tile_b = min(tile_b, _round_up(B, 8))       # keep sublane-aligned, small B stays small
    b_pad = _round_up(B, tile_b)

    xp = jnp.zeros((b_pad, k1), jnp.float32).at[:B, :im_dim].set(x)
    xp = xp.astype(jnp.bfloat16)

    w1p = (jnp.zeros((k1, d1), jnp.float32).at[:im_dim, :].set(w1)
           .astype(jnp.bfloat16))
    w2p = w2.astype(jnp.bfloat16)
    w3p = w3.astype(jnp.bfloat16)
    w4p = (jnp.zeros((w4.shape[0], n4), jnp.float32).at[:, :out_dim].set(w4)
           .astype(jnp.bfloat16))
    b4p = jnp.zeros((1, n4), jnp.float32).at[:, :out_dim].set(b4)

    # --- Grid / specs ------------------------------------------------------
    grid = (b_pad // tile_b,)
    batch_map = lambda i: (i, 0)     # x / out tiles walk the batch
    const_map = lambda i: (0, 0)     # weights & biases stay resident in VMEM

    in_arrays = [xp, w1p, b1, w2p, b2, w3p, b3, w4p, b4p]
    in_specs = [pl.BlockSpec((tile_b, k1), batch_map)]
    in_specs += [pl.BlockSpec(a.shape, const_map) for a in in_arrays[1:]]
    out_specs = pl.BlockSpec((tile_b, n4), batch_map)

    flops = 2 * b_pad * (k1 * d1 + d1 * d2 + d2 * d3 + d3 * n4)
    bytes_accessed = int(sum(a.size * a.dtype.itemsize for a in in_arrays)
                         + b_pad * n4 * 4)

    out = pl.pallas_call(
        discriminator_kernel,
        out_shape=jax.ShapeDtypeStruct((b_pad, n4), jnp.float32),
        grid=grid,
        in_specs=in_specs,
        out_specs=out_specs,
        compiler_params=pltpu.CompilerParams(
            dimension_semantics=("parallel",),
            vmem_limit_bytes=16 << 20,
        ),
        cost_estimate=pl.CostEstimate(
            flops=flops, transcendentals=0, bytes_accessed=bytes_accessed),
    )(*in_arrays)

    # Drop batch padding and the lane padding of the final layer.
    return out[:B, :out_dim]


def init_params(key, im_dim=784, hidden_dim=128):
    """PyTorch nn.Linear-style init: U(-1/sqrt(fan_in), 1/sqrt(fan_in)); W stored as (in, out)."""
    dims = [im_dim, hidden_dim * 4, hidden_dim * 2, hidden_dim, 1]
    params = []
    for i in range(4):
        fan_in, fan_out = dims[i], dims[i + 1]
        key, kw, kb = jax.random.split(key, 3)
        bound = 1.0 / jnp.sqrt(fan_in)
        w_t = jax.random.uniform(kw, (fan_in, fan_out), jnp.float32, -bound, bound)
        b = jax.random.uniform(kb, (1, fan_out), jnp.float32, -bound, bound)
        params.append((w_t, b))
    return params


def discriminator_reference(x, params):
    h = x
    for i, (w, b) in enumerate(params):
        h = h @ w + b
        if i < 3:
            h = jnp.where(h > 0, h, 0.2 * h)
    return h


if __name__ == "__main__":
    key = jax.random.PRNGKey(0)
    k_params, k_x = jax.random.split(key)

    im_dim, hidden_dim, batch = 784, 128, 8
    params = init_params(k_params, im_dim=im_dim, hidden_dim=hidden_dim)
    x = jax.random.normal(k_x, (batch, im_dim), jnp.float32)

    out = discriminator_forward(x, params)
    out = jax.block_until_ready(out)

    ref = discriminator_reference(x, params)
    assert out.shape == (batch, 1), out.shape
    # bf16 matmul inputs (f32 accumulation): loosened tolerance vs f32 reference.
    assert jnp.allclose(out, ref, atol=2e-2, rtol=2e-2), "mismatch vs reference"

    print("KERNEL_OK")
</pallas_src>

<mosaic_0001>
module attributes {stable_mosaic.version = 11 : i64} {
  func.func @discriminator_kernel(%arg0: i32, %arg1: memref<8x896xbf16, #tpu.memory_space<vmem>>, %arg2: memref<896x512xbf16, #tpu.memory_space<vmem>>, %arg3: memref<1x512xf32, #tpu.memory_space<vmem>>, %arg4: memref<512x256xbf16, #tpu.memory_space<vmem>>, %arg5: memref<1x256xf32, #tpu.memory_space<vmem>>, %arg6: memref<256x128xbf16, #tpu.memory_space<vmem>>, %arg7: memref<1x128xf32, #tpu.memory_space<vmem>>, %arg8: memref<128x128xbf16, #tpu.memory_space<vmem>>, %arg9: memref<1x128xf32, #tpu.memory_space<vmem>>, %arg10: memref<8x128xf32, #tpu.memory_space<vmem>>) attributes {dimension_semantics = [#tpu.dimension_semantics<parallel>], iteration_bounds = array<i64: 1>, scalar_prefetch = 0 : i64, scratch_operands = 0 : i64, tpu.core_type = #tpu.core_type<tc>, window_params = [{transform_indices = @transform_0, window_bounds = array<i64: 8, 896>}, {pipeline_mode = #tpu.pipeline_mode<synchronous>, transform_indices = @transform_1, window_bounds = array<i64: 896, 512>}, {pipeline_mode = #tpu.pipeline_mode<synchronous>, transform_indices = @transform_2, window_bounds = array<i64: 1, 512>}, {pipeline_mode = #tpu.pipeline_mode<synchronous>, transform_indices = @transform_3, window_bounds = array<i64: 512, 256>}, {pipeline_mode = #tpu.pipeline_mode<synchronous>, transform_indices = @transform_4, window_bounds = array<i64: 1, 256>}, {pipeline_mode = #tpu.pipeline_mode<synchronous>, transform_indices = @transform_5, window_bounds = array<i64: 256, 128>}, {pipeline_mode = #tpu.pipeline_mode<synchronous>, transform_indices = @transform_6, window_bounds = array<i64: 1, 128>}, {pipeline_mode = #tpu.pipeline_mode<synchronous>, transform_indices = @transform_7, window_bounds = array<i64: 128, 128>}, {pipeline_mode = #tpu.pipeline_mode<synchronous>, transform_indices = @transform_8, window_bounds = array<i64: 1, 128>}, {transform_indices = @transform_9, window_bounds = array<i64: 8, 128>}]} {
    %c0 = arith.constant 0 : index
    %c0_0 = arith.constant 0 : index
    %0 = vector.load %arg1[%c0, %c0_0] : memref<8x896xbf16, #tpu.memory_space<vmem>>, vector<8x896xbf16>
    %c0_1 = arith.constant 0 : index
    %c0_2 = arith.constant 0 : index
    %1 = vector.load %arg2[%c0_1, %c0_2] : memref<896x512xbf16, #tpu.memory_space<vmem>>, vector<896x512xbf16>
    %cst = arith.constant dense<0.000000e+00> : vector<8x512xf32>
    %2 = tpu.matmul %0, %1, %cst {dimension_numbers = #tpu.dot_dimension_numbers<[1], [0], [0], [1], [0, 0, 1, 1], [], []>} : vector<8x896xbf16>, vector<896x512xbf16>, vector<8x512xf32> -> vector<8x512xf32>
    %c0_3 = arith.constant 0 : index
    %c0_4 = arith.constant 0 : index
    %3 = vector.load %arg3[%c0_3, %c0_4] : memref<1x512xf32, #tpu.memory_space<vmem>>, vector<1x512xf32>
    %4 = vector.broadcast %3 : vector<1x512xf32> to vector<8x512xf32>
    %5 = arith.addf %2, %4 : vector<8x512xf32>
    %cst_5 = arith.constant 0.000000e+00 : f32
    %6 = vector.broadcast %cst_5 : f32 to vector<8x512xf32>
    %7 = arith.cmpf ogt, %5, %6 : vector<8x512xf32>
    %cst_6 = arith.constant 2.000000e-01 : f32
    %8 = vector.broadcast %cst_6 : f32 to vector<8x512xf32>
    %9 = arith.mulf %8, %5 : vector<8x512xf32>
    %10 = arith.select %7, %5, %9 : vector<8x512xi1>, vector<8x512xf32>
    %11 = arith.truncf %10 : vector<8x512xf32> to vector<8x512xbf16>
    %c0_7 = arith.constant 0 : index
    %c0_8 = arith.constant 0 : index
    %12 = vector.load %arg4[%c0_7, %c0_8] : memref<512x256xbf16, #tpu.memory_space<vmem>>, vector<512x256xbf16>
    %cst_9 = arith.constant dense<0.000000e+00> : vector<8x256xf32>
    %13 = tpu.matmul %11, %12, %cst_9 {dimension_numbers = #tpu.dot_dimension_numbers<[1], [0], [0], [1], [0, 0, 1, 1], [], []>} : vector<8x512xbf16>, vector<512x256xbf16>, vector<8x256xf32> -> vector<8x256xf32>
    %c0_10 = arith.constant 0 : index
    %c0_11 = arith.constant 0 : index
    %14 = vector.load %arg5[%c0_10, %c0_11] : memref<1x256xf32, #tpu.memory_space<vmem>>, vector<1x256xf32>
    %15 = vector.broadcast %14 : vector<1x256xf32> to vector<8x256xf32>
    %16 = arith.addf %13, %15 : vector<8x256xf32>
    %cst_12 = arith.constant 0.000000e+00 : f32
    %17 = vector.broadcast %cst_12 : f32 to vector<8x256xf32>
    %18 = arith.cmpf ogt, %16, %17 : vector<8x256xf32>
    %cst_13 = arith.constant 2.000000e-01 : f32
    %19 = vector.broadcast %cst_13 : f32 to vector<8x256xf32>
    %20 = arith.mulf %19, %16 : vector<8x256xf32>
    %21 = arith.select %18, %16, %20 : vector<8x256xi1>, vector<8x256xf32>
    %22 = arith.truncf %21 : vector<8x256xf32> to vector<8x256xbf16>
    %c0_14 = arith.constant 0 : index
    %c0_15 = arith.constant 0 : index
    %23 = vector.load %arg6[%c0_14, %c0_15] : memref<256x128xbf16, #tpu.memory_space<vmem>>, vector<256x128xbf16>
    %cst_16 = arith.constant dense<0.000000e+00> : vector<8x128xf32>
    %24 = tpu.matmul %22, %23, %cst_16 {dimension_numbers = #tpu.dot_dimension_numbers<[1], [0], [0], [1], [0, 0, 1, 1], [], []>} : vector<8x256xbf16>, vector<256x128xbf16>, vector<8x128xf32> -> vector<8x128xf32>
    %c0_17 = arith.constant 0 : index
    %c0_18 = arith.constant 0 : index
    %25 = vector.load %arg7[%c0_17, %c0_18] : memref<1x128xf32, #tpu.memory_space<vmem>>, vector<1x128xf32>
    %26 = vector.broadcast %25 : vector<1x128xf32> to vector<8x128xf32>
    %27 = arith.addf %24, %26 : vector<8x128xf32>
    %cst_19 = arith.constant 0.000000e+00 : f32
    %28 = vector.broadcast %cst_19 : f32 to vector<8x128xf32>
    %29 = arith.cmpf ogt, %27, %28 : vector<8x128xf32>
    %cst_20 = arith.constant 2.000000e-01 : f32
    %30 = vector.broadcast %cst_20 : f32 to vector<8x128xf32>
    %31 = arith.mulf %30, %27 : vector<8x128xf32>
    %32 = arith.select %29, %27, %31 : vector<8x128xi1>, vector<8x128xf32>
    %33 = arith.truncf %32 : vector<8x128xf32> to vector<8x128xbf16>
    %c0_21 = arith.constant 0 : index
    %c0_22 = arith.constant 0 : index
    %34 = vector.load %arg8[%c0_21, %c0_22] : memref<128x128xbf16, #tpu.memory_space<vmem>>, vector<128x128xbf16>
    %cst_23 = arith.constant dense<0.000000e+00> : vector<8x128xf32>
    %35 = tpu.matmul %33, %34, %cst_23 {dimension_numbers = #tpu.dot_dimension_numbers<[1], [0], [0], [1], [0, 0, 1, 1], [], []>} : vector<8x128xbf16>, vector<128x128xbf16>, vector<8x128xf32> -> vector<8x128xf32>
    %c0_24 = arith.constant 0 : index
    %c0_25 = arith.constant 0 : index
    %36 = vector.load %arg9[%c0_24, %c0_25] : memref<1x128xf32, #tpu.memory_space<vmem>>, vector<1x128xf32>
    %37 = vector.broadcast %36 : vector<1x128xf32> to vector<8x128xf32>
    %38 = arith.addf %35, %37 : vector<8x128xf32>
    %c0_26 = arith.constant 0 : index
    %c0_27 = arith.constant 0 : index
    %39 = vector.load %arg10[%c0_26, %c0_27] : memref<8x128xf32, #tpu.memory_space<vmem>>, vector<8x128xf32>
    tpu.vector_store %arg10[%c0_26, %c0_27], %38 {strides = array<i32>} : memref<8x128xf32, #tpu.memory_space<vmem>>, vector<8x128xf32>,
    return
  }
  func.func @transform_0(%arg0: i32) -> (i32, i32) {
    %c0_i32 = arith.constant 0 : i32
    %c0_i32_0 = arith.constant 0 : i32
    return %arg0, %c0_i32 : i32, i32
  }
  func.func @transform_1(%arg0: i32) -> (i32, i32) {
    %c0_i32 = arith.constant 0 : i32
    %c0_i32_0 = arith.constant 0 : i32
    %c0_i32_1 = arith.constant 0 : i32
    return %c0_i32, %c0_i32_0 : i32, i32
  }
  func.func @transform_2(%arg0: i32) -> (i32, i32) {
    %c0_i32 = arith.constant 0 : i32
    %c0_i32_0 = arith.constant 0 : i32
    %c0_i32_1 = arith.constant 0 : i32
    return %c0_i32, %c0_i32_0 : i32, i32
  }
  func.func @transform_3(%arg0: i32) -> (i32, i32) {
    %c0_i32 = arith.constant 0 : i32
    %c0_i32_0 = arith.constant 0 : i32
    %c0_i32_1 = arith.constant 0 : i32
    return %c0_i32, %c0_i32_0 : i32, i32
  }
  func.func @transform_4(%arg0: i32) -> (i32, i32) {
    %c0_i32 = arith.constant 0 : i32
    %c0_i32_0 = arith.constant 0 : i32
    %c0_i32_1 = arith.constant 0 : i32
    return %c0_i32, %c0_i32_0 : i32, i32
  }
  func.func @transform_5(%arg0: i32) -> (i32, i32) {
    %c0_i32 = arith.constant 0 : i32
    %c0_i32_0 = arith.constant 0 : i32
    %c0_i32_1 = arith.constant 0 : i32
    return %c0_i32, %c0_i32_0 : i32, i32
  }
  func.func @transform_6(%arg0: i32) -> (i32, i32) {
    %c0_i32 = arith.constant 0 : i32
    %c0_i32_0 = arith.constant 0 : i32
    %c0_i32_1 = arith.constant 0 : i32
    return %c0_i32, %c0_i32_0 : i32, i32
  }
  func.func @transform_7(%arg0: i32) -> (i32, i32) {
    %c0_i32 = arith.constant 0 : i32
    %c0_i32_0 = arith.constant 0 : i32
    %c0_i32_1 = arith.constant 0 : i32
    return %c0_i32, %c0_i32_0 : i32, i32
  }
  func.func @transform_8(%arg0: i32) -> (i32, i32) {
    %c0_i32 = arith.constant 0 : i32
    %c0_i32_0 = arith.constant 0 : i32
    %c0_i32_1 = arith.constant 0 : i32
    return %c0_i32, %c0_i32_0 : i32, i32
  }
  func.func @transform_9(%arg0: i32) -> (i32, i32) {
    %c0_i32 = arith.constant 0 : i32
    %c0_i32_0 = arith.constant 0 : i32
    return %arg0, %c0_i32 : i32, i32
  }
}

</mosaic_0001>

<bundles_post_ra>
// kernel: tpu_custom_call.1
= control target key start
LH: loop header
LB: loop body
LE: loop exit
PB: predicated region body
PF: predicated region fallthrough
CT: control target
= control target key end

     0   :  { %14 = vsyncpa [#allocation3], 0  ;;  %s4586_s0 = inlined_call_operand.hbm [shape: bf16[8,896], index: 0, kind: input, shape index: {}]   ;;  %s4587_s1 = inlined_call_operand.hbm [shape: bf16[896,512], index: 1, kind: input, shape index: {}]   ;;  %s4588_s2 = inlined_call_operand.hbm [shape: f32[1,512], index: 2, kind: input, shape index: {}]   ;;  %s4589_s3 = inlined_call_operand.hbm [shape: bf16[512,256], index: 3, kind: input, shape index: {}]   ;;  %s4590_s4 = inlined_call_operand.vmem [shape: f32[1,256], index: 4, kind: input, shape index: {}]   ;;  %s4591_s5 = inlined_call_operand.hbm [shape: bf16[256,128], index: 5, kind: input, shape index: {}]   ;;  %s4592_s6 = inlined_call_operand.vmem [shape: f32[1,128], index: 6, kind: input, shape index: {}]   ;;  %s4593_s7 = inlined_call_operand.hbm [shape: bf16[128,128], index: 7, kind: input, shape index: {}]   ;;  %s4594_s8 = inlined_call_operand.vmem [shape: f32[1,128], index: 8, kind: input, shape index: {}]   ;;  %s4595_s9 = inlined_call_operand.hbm [shape: f32[8,128], index: 9, kind: output, shape index: {}]  }
   0x1   :  { %15 = vsyncpa [#allocation6], 0 }
   0x2   :  { %16 = vsyncpa [#allocation9], 0 }
   0x3   :  { %17 = vsyncpa [#allocation12], 0  ;;  %s34_s11 = sshll.u32 %s4587_s1, 4  ;;  %s35_s11 = int_to_ptr.hbm [resolvable:$true] %s34_s11 }
   0x4   :  { %18 = vsyncpa [#allocation4], 0  ;;  %s4405_s12 = smov [#allocation5]   ;;  %s58_s16 = sshll.u32 %s4589_s3, 4  ;;  %s59_s16 = int_to_ptr.hbm [resolvable:$true] %s58_s16 }
   0x5   :  { %s36_s13 = sshll.u32 %s4405_s12, 4  ;;  %s4406_s17 = smov 256   ;;  %s37_s13 = int_to_ptr.vmem [resolvable:$true] %s36_s13 }
   0x6   :  { %s4407_s18 = smov 16   ;;  %s4408_s19 = smov [#allocation8]  }
   0x7   :  { %42 = dma.hbm_to_vmem [thread:$0]  %s35_s11, 28672, %s37_s13, [#allocation6], %s4406_s17, %s4406_s17, %s4407_s18  }
   0x8   :  { %s60_s20 = sshll.u32 %s4408_s19, 4  ;;  %s4409_s21 = smov 128   ;;  %s61_s20 = int_to_ptr.vmem [resolvable:$true] %s60_s20 }
   0x9   :  { %s4410_s22 = smov 8   ;;  %s24_s24 = sshll.u32 %s4586_s0, 4  ;;  %s25_s24 = int_to_ptr.hbm [resolvable:$true] %s24_s24 }
   0xa   :  { %66 = dma.hbm_to_vmem [thread:$0]  %s59_s16, 8192, %s61_s20, [#allocation9], %s4409_s21, %s4409_s21, %s4410_s22  }
   0xb   :  { %s4411_s25 = smov [#allocation2]   ;;  %s48_s28 = sshll.u32 %s4588_s2, 4  ;;  %s49_s28 = int_to_ptr.hbm [resolvable:$true] %s48_s28 }
   0xc   :  { %s26_s26 = sshll.u32 %s4411_s25, 4  ;;  %s4412_s29 = smov [#allocation7]   ;;  %s27_s26 = int_to_ptr.vmem [resolvable:$true] %s26_s26 }
   0xd   :  { %29 = dma.hbm_to_vmem [thread:$0]  %s25_s24, 448, %s27_s26, [#allocation3]  }
   0xe   :  { %s50_s30 = sshll.u32 %s4412_s29, 4  ;;  %s73_s12 = sshll.u32 %s4591_s5, 4  ;;  %s51_s30 = int_to_ptr.vmem [resolvable:$true] %s50_s30  ;;  %s74_s12 = int_to_ptr.hbm [resolvable:$true] %s73_s12 }
   0xf   :  { %53 = dma.hbm_to_vmem [thread:$0]  %s49_s28, 64, %s51_s30, [#allocation6]  }
  0x10   :  { %s4413_s0 = smov [#allocation10]   ;;  %s88_s16 = sshll.u32 %s4593_s7, 4  ;;  %s89_s16 = int_to_ptr.hbm [resolvable:$true] %s88_s16 }
  0x11   :  { %s75_s13 = sshll.u32 %s4413_s0, 4  ;;  %s4414_s17 = smov 64   ;;  %s76_s13 = int_to_ptr.vmem [resolvable:$true] %s75_s13 }
  0x12   :  { %s4415_s2 = smov 4   ;;  %s4416_s18 = smov [#allocation11]  }
  0x13   :  { %81 = dma.hbm_to_vmem [thread:$0]  %s74_s12, 2048, %s76_s13, [#allocation9], %s4414_s17, %s4414_s17, %s4415_s2  }
  0x14   :  { %s90_s19 = sshll.u32 %s4416_s18, 4  ;;  %s91_s19 = int_to_ptr.vmem [resolvable:$true] %s90_s19 }
  0x15   :  { %96 = dma.hbm_to_vmem [thread:$0]  %s89_s16, 1024, %s91_s19, [#allocation12], %s4414_s17, %s4414_s17, %s4415_s2  }
  0x16   :  { %4395 = dma.done.wait [#allocation3], 448  }
  0x17   :  { %4396 = vsyncadd [#allocation3], 4294966848 }
  0x18   :  { %4397 = dma.done.wait [#allocation6], 28736  }
  0x19   :  { %4398 = vsyncadd [#allocation6], 4294938560 }
  0x1a   :  { %4399 = dma.done.wait [#allocation9], 10240  }
  0x1b   :  { %4400 = vsyncadd [#allocation9], 4294957056 }
  0x1c   :  { %4401 = dma.done.wait [#allocation12], 1024  }
  0x1d   :  { %4402 = vsyncadd [#allocation12], 4294966272  ;;  %v2766_v0 = vld [vmem:[#allocation5 + $0xe0] sm:$0xf]  ;;  %v3930_v1 = vld [vmem:[#allocation5 + $0xec] sm:$0xf0] }
  0x1e   :  { %v2894_v2 = vld [vmem:[#allocation5 + $0x1e0] sm:$0xf]  ;;  %v2767_v3 = vor.u32 %v3930_v1, %v2766_v0  ;;  %v3962_v4 = vld [vmem:[#allocation5 + $0x1ec] sm:$0xf0]  ;;  %s4417_s1 = smov [#allocation13]   ;;  %s2639_s26 = sshll.u32 %s4595_s9, 4  ;;  %s2640_s26 = int_to_ptr.hbm [resolvable:$true] %s2639_s26 }
  0x1f   :  { %v3022_v5 = vld [vmem:[#allocation5 + $0x2e0] sm:$0xf]  ;;  %v3994_v6 = vld [vmem:[#allocation5 + $0x2ec] sm:$0xf0]  ;;  %v2895_v7 = vor.u32 %v3962_v4, %v2894_v2  ;;  %s2637_s23 = sshll.u32 %s4417_s1, 4  ;;  %s2638_s23 = int_to_ptr.vmem [resolvable:$true] %s2637_s23 }
  0x20   :  { %v3023_v8 = vor.u32 %v3994_v6, %v3022_v5  ;;  %v3150_v9 = vld [vmem:[#allocation5 + $0x3e0] sm:$0xf]  ;;  %v4026_v10 = vld [vmem:[#allocation5 + $0x3ec] sm:$0xf0]  ;;  %1506 = vmatpush.bf16.msra.mxu0 %v2767_v3 }
  0x21   :  { %v2750_v11 = vld [vmem:[#allocation5 + $0xc0] sm:$0xf]  ;;  %v3151_v12 = vor.u32 %v4026_v10, %v3150_v9  ;;  %v3926_v13 = vld [vmem:[#allocation5 + $0xcc] sm:$0xf0]  ;;  %1519 = vmatpush.bf16.msra.mxu1 %v2895_v7 }
  0x22   :  { %v2878_v14 = vld [vmem:[#allocation5 + $0x1c0] sm:$0xf]  ;;  %v3958_v15 = vld [vmem:[#allocation5 + $0x1cc] sm:$0xf0]  ;;  %1532 = vmatpush.bf16.msra.mxu2 %v3023_v8  ;;  %v2751_v16 = vor.u32 %v3926_v13, %v2750_v11 }
  0x23   :  { %v2879_v17 = vor.u32 %v3958_v15, %v2878_v14  ;;  %v3006_v18 = vld [vmem:[#allocation5 + $0x2c0] sm:$0xf]  ;;  %v3990_v19 = vld [vmem:[#allocation5 + $0x2cc] sm:$0xf0]  ;;  %1545 = vmatpush.bf16.msra.mxu3 %v3151_v12 }
  0x24   :  { %v3134_v20 = vld [vmem:[#allocation5 + $0x3c0] sm:$0xf]  ;;  %v3007_v21 = vor.u32 %v3990_v19, %v3006_v18  ;;  %v4022_v22 = vld [vmem:[#allocation5 + $0x3cc] sm:$0xf0]  ;;  %1507 = vmatpush.bf16.msra.mxu0 %v2751_v16 }
  0x25   :  { %v2734_v23 = vld [vmem:[#allocation5 + $0xa0] sm:$0xf]  ;;  %v3922_v24 = vld [vmem:[#allocation5 + $0xac] sm:$0xf0]  ;;  %v3135_v25 = vor.u32 %v4022_v22, %v3134_v20  ;;  %1520 = vmatpush.bf16.msra.mxu1 %v2879_v17 }
  0x26   :  { %v2862_v26 = vld [vmem:[#allocation5 + $0x1a0] sm:$0xf]  ;;  %v3954_v27 = vld [vmem:[#allocation5 + $0x1ac] sm:$0xf0]  ;;  %v2735_v29 = vor.u32 %v3922_v24, %v2734_v23  ;;  %1533 = vmatpush.bf16.msra.mxu2 %v3007_v21 }
  0x27   :  { %v2990_v28 = vld [vmem:[#allocation5 + $0x2a0] sm:$0xf]  ;;  %v3986_v30 = vld [vmem:[#allocation5 + $0x2ac] sm:$0xf0]  ;;  %v2863_v33 = vor.u32 %v3954_v27, %v2862_v26  ;;  %1546 = vmatpush.bf16.msra.mxu3 %v3135_v25 }
  0x28   :  { %v3118_v31 = vld [vmem:[#allocation5 + $0x3a0] sm:$0xf]  ;;  %v4018_v32 = vld [vmem:[#allocation5 + $0x3ac] sm:$0xf0]  ;;  %v2991_v34 = vor.u32 %v3986_v30, %v2990_v28  ;;  %1508 = vmatpush.bf16.msra.mxu0 %v2735_v29 }
  0x29   :  { %v2718_v35 = vld [vmem:[#allocation5 + $0x80] sm:$0xf]  ;;  %v3918_v36 = vld [vmem:[#allocation5 + $0x8c] sm:$0xf0]  ;;  %v3119_v38 = vor.u32 %v4018_v32, %v3118_v31  ;;  %1521 = vmatpush.bf16.msra.mxu1 %v2863_v33 }
  0x2a   :  { %v2846_v37 = vld [vmem:[#allocation5 + $0x180] sm:$0xf]  ;;  %v3950_v39 = vld [vmem:[#allocation5 + $0x18c] sm:$0xf0]  ;;  %v2719_v44 = vor.u32 %v3918_v36, %v2718_v35  ;;  %1534 = vmatpush.bf16.msra.mxu2 %v2991_v34 }
  0x2b   :  { %v2974_v40 = vld [vmem:[#allocation5 + $0x280] sm:$0xf]  ;;  %v3982_v41 = vld [vmem:[#allocation5 + $0x28c] sm:$0xf0]  ;;  %v2847_v45 = vor.u32 %v3950_v39, %v2846_v37  ;;  %1547 = vmatpush.bf16.msra.mxu3 %v3119_v38  ;;  %v3928_v37 = vld [vmem:[#allocation5 + $0xe4] sm:$0xf] }
  0x2c   :  { %v3102_v42 = vld [vmem:[#allocation5 + $0x380] sm:$0xf]  ;;  %v4014_v43 = vld [vmem:[#allocation5 + $0x38c] sm:$0xf0]  ;;  %v2975_v46 = vor.u32 %v3982_v41, %v2974_v40  ;;  %1509 = vmatpush.bf16.msra.mxu0 %v2719_v44  ;;  %v2768_v38 = vld [vmem:[#allocation5 + $0xf0] sm:$0xf0] }
  0x2d   :  { %v2702_v47 = vld [vmem:[#allocation5 + $0x60] sm:$0xf]  ;;  %v3914_v48 = vld [vmem:[#allocation5 + $0x6c] sm:$0xf0]  ;;  %v3103_v50 = vor.u32 %v4014_v43, %v3102_v42  ;;  %1522 = vmatpush.bf16.msra.mxu1 %v2847_v45 }
  0x2e   :  { %v2830_v49 = vld [vmem:[#allocation5 + $0x160] sm:$0xf]  ;;  %v3946_v51 = vld [vmem:[#allocation5 + $0x16c] sm:$0xf0]  ;;  %v2703_v56 = vor.u32 %v3914_v48, %v2702_v47  ;;  %1535 = vmatpush.bf16.msra.mxu2 %v2975_v46  ;;  %v2771_v46 = vor.u32 %v3928_v37, %v2768_v38 }
  0x2f   :  { %v2958_v52 = vld [vmem:[#allocation5 + $0x260] sm:$0xf]  ;;  %v3978_v53 = vld [vmem:[#allocation5 + $0x26c] sm:$0xf0]  ;;  %v2831_v57 = vor.u32 %v3946_v51, %v2830_v49  ;;  %1548 = vmatpush.bf16.msra.mxu3 %v3103_v50  ;;  %v3924_v50 = vld [vmem:[#allocation5 + $0xc4] sm:$0xf] }
  0x30   :  { %v3086_v54 = vld [vmem:[#allocation5 + $0x360] sm:$0xf]  ;;  %v4010_v55 = vld [vmem:[#allocation5 + $0x36c] sm:$0xf0]  ;;  %v2959_v58 = vor.u32 %v3978_v53, %v2958_v52  ;;  %1510 = vmatpush.bf16.msra.mxu0 %v2703_v56  ;;  %v2752_v51 = vld [vmem:[#allocation5 + $0xd0] sm:$0xf0] }
  0x31   :  { %v2686_v59 = vld [vmem:[#allocation5 + $0x40] sm:$0xf]  ;;  %v3910_v60 = vld [vmem:[#allocation5 + $0x4c] sm:$0xf0]  ;;  %v3087_v62 = vor.u32 %v4010_v55, %v3086_v54  ;;  %1523 = vmatpush.bf16.msra.mxu1 %v2831_v57 }
  0x32   :  { %v2814_v61 = vld [vmem:[#allocation5 + $0x140] sm:$0xf]  ;;  %v3942_v63 = vld [vmem:[#allocation5 + $0x14c] sm:$0xf0]  ;;  %v2687_v4 = vor.u32 %v3910_v60, %v2686_v59  ;;  %1536 = vmatpush.bf16.msra.mxu2 %v2959_v58  ;;  %v2755_v59 = vor.u32 %v3924_v50, %v2752_v51 }
  0x33   :  { %v2942_v0 = vld [vmem:[#allocation5 + $0x240] sm:$0xf]  ;;  %v3974_v1 = vld [vmem:[#allocation5 + $0x24c] sm:$0xf0]  ;;  %v2815_v5 = vor.u32 %v3942_v63, %v2814_v61  ;;  %1549 = vmatpush.bf16.msra.mxu3 %v3087_v62 }
  0x34   :  { %v3070_v2 = vld [vmem:[#allocation5 + $0x340] sm:$0xf]  ;;  %v4006_v3 = vld [vmem:[#allocation5 + $0x34c] sm:$0xf0]  ;;  %v2943_v6 = vor.u32 %v3974_v1, %v2942_v0  ;;  %1511 = vmatpush.bf16.msra.mxu0 %v2687_v4  ;;  %v3920_v1 = vld [vmem:[#allocation5 + $0xa4] sm:$0xf] }
  0x35   :  { %v2670_v7 = vld [vmem:[#allocation5 + $0x20] sm:$0xf]  ;;  %v3906_v8 = vld [vmem:[#allocation5 + $0x2c] sm:$0xf0]  ;;  %v3071_v10 = vor.u32 %v4006_v3, %v3070_v2  ;;  %1524 = vmatpush.bf16.msra.mxu1 %v2815_v5  ;;  %v2736_v2 = vld [vmem:[#allocation5 + $0xb0] sm:$0xf0] }
  0x36   :  { %v2798_v9 = vld [vmem:[#allocation5 + $0x120] sm:$0xf]  ;;  %v3938_v11 = vld [vmem:[#allocation5 + $0x12c] sm:$0xf0]  ;;  %v2671_v16 = vor.u32 %v3906_v8, %v2670_v7  ;;  %1537 = vmatpush.bf16.msra.mxu2 %v2943_v6  ;;  %v123_v5 = vld [vmem:[#allocation2] sm:$0xff] }
  0x37   :  { %v2926_v12 = vld [vmem:[#allocation5 + $0x220] sm:$0xf]  ;;  %v3970_v13 = vld [vmem:[#allocation5 + $0x22c] sm:$0xf0]  ;;  %v2799_v19 = vor.u32 %v3938_v11, %v2798_v9  ;;  %1550 = vmatpush.bf16.msra.mxu3 %v3071_v10 }
  0x38   :  { %v3054_v14 = vld [vmem:[#allocation5 + $0x320] sm:$0xf]  ;;  %v4002_v15 = vld [vmem:[#allocation5 + $0x32c] sm:$0xf0]  ;;  %v2927_v20 = vor.u32 %v3970_v13, %v2926_v12  ;;  %1512 = vmatpush.bf16.msra.mxu0 %v2671_v16  ;;  %v365_v12 = vunpack.c.l.b16 %v123_v5  ;;  %v366_v13 = vunpack.c.h.b16 %v123_v5 }
  0x39   :  { %v2654_v17 = vld [vmem:[#allocation5] sm:$0xf]  ;;  %v3902_v18 = vld [vmem:[#allocation5 + $0xc] sm:$0xf0]  ;;  %v3055_v24 = vor.u32 %v4002_v15, %v3054_v14  ;;  %1525 = vmatpush.bf16.msra.mxu1 %v2799_v19  ;;  %v2739_v14 = vor.u32 %v3920_v1, %v2736_v2  ;;  %v2720_v19 = vld [vmem:[#allocation5 + $0x90] sm:$0xf0] }
  0x3a   :  { %v2782_v21 = vld [vmem:[#allocation5 + $0x100] sm:$0xf]  ;;  %v3934_v22 = vld [vmem:[#allocation5 + $0x10c] sm:$0xf0]  ;;  %v2655_v31 = vor.u32 %v3902_v18, %v2654_v17  ;;  %1538 = vmatpush.bf16.msra.mxu2 %v2927_v20  ;;  %v3916_v18 = vld [vmem:[#allocation5 + $0x84] sm:$0xf]  ;;  %v4491_v20 = vpack.c.b16 %v365_v12, %v365_v12 }
  0x3b   :  { %v2910_v23 = vld [vmem:[#allocation5 + $0x200] sm:$0xf]  ;;  %v3966_v25 = vld [vmem:[#allocation5 + $0x20c] sm:$0xf0]  ;;  %v2783_v35 = vor.u32 %v3934_v22, %v2782_v21  ;;  %1551 = vmatpush.bf16.msra.mxu3 %v3055_v24  ;;  %v4493_v21 = vpack.c.b16 %v366_v13, %v366_v13  ;;  %v3992_v12 = vld [vmem:[#allocation5 + $0x2e4] sm:$0xf] }
  0x3c   :  { %v3038_v26 = vld [vmem:[#allocation5 + $0x300] sm:$0xf]  ;;  %v3998_v27 = vld [vmem:[#allocation5 + $0x30c] sm:$0xf0]  ;;  %v2911_v36 = vor.u32 %v3966_v25, %v2910_v23  ;;  %1513 = vmatpush.bf16.msra.mxu0 %v2655_v31 }
  0x3d   :  { %v3278_v28 = vld [vmem:[#allocation5 + $0x4e0] sm:$0xf]  ;;  %v4058_v29 = vld [vmem:[#allocation5 + $0x4ec] sm:$0xf0]  ;;  %v3039_v39 = vor.u32 %v3998_v27, %v3038_v26  ;;  %1526 = vmatpush.bf16.msra.mxu1 %v2783_v35 }
  0x3e   :  { %v3406_v30 = vld [vmem:[#allocation5 + $0x5e0] sm:$0xf]  ;;  %v4090_v32 = vld [vmem:[#allocation5 + $0x5ec] sm:$0xf0]  ;;  %v3279_v40 = vor.u32 %v4058_v29, %v3278_v28  ;;  %1539 = vmatpush.bf16.msra.mxu2 %v2911_v36  ;;  %v2723_v28 = vor.u32 %v3916_v18, %v2720_v19 }
  0x3f   :  { %v3534_v33 = vld [vmem:[#allocation5 + $0x6e0] sm:$0xf]  ;;  %v4122_v34 = vld [vmem:[#allocation5 + $0x6ec] sm:$0xf0]  ;;  %v3407_v41 = vor.u32 %v4090_v32, %v3406_v30  ;;  %1552 = vmatpush.bf16.msra.mxu3 %v3039_v39  ;;  %1514 = vmatmul.bf16.vlgmr.msra.gmra.mxu0 %v4491_v20  ;;  %v3912_v32 = vld [vmem:[#allocation5 + $0x64] sm:$0xf] }
  0x40   :  { %v3535_v42 = vor.u32 %v4122_v34, %v3534_v33  ;;  %v3262_v43 = vld [vmem:[#allocation5 + $0x4c0] sm:$0xf]  ;;  %v4054_v44 = vld [vmem:[#allocation5 + $0x4cc] sm:$0xf0]  ;;  %1558 = vmatpush.bf16.msrb.mxu0 %v3279_v40  ;;  %v2704_v33 = vld [vmem:[#allocation5 + $0x70] sm:$0xf0]  ;;  %1527 = vmatmul.bf16.vlgmr.msra.gmra.mxu1 %v4493_v21 }
  0x41   :  { %v3390_v45 = vld [vmem:[#allocation5 + $0x5c0] sm:$0xf]  ;;  %v4086_v47 = vld [vmem:[#allocation5 + $0x5cc] sm:$0xf0]  ;;  %v3263_v52 = vor.u32 %v4054_v44, %v3262_v43  ;;  %1571 = vmatpush.bf16.msrb.mxu1 %v3407_v41  ;;  %v2707_v40 = vor.u32 %v3912_v32, %v2704_v33  ;;  %v3908_v44 = vld [vmem:[#allocation5 + $0x44] sm:$0xf] }
  0x42   :  { %v3518_v48 = vld [vmem:[#allocation5 + $0x6c0] sm:$0xf]  ;;  %v4118_v49 = vld [vmem:[#allocation5 + $0x6cc] sm:$0xf0]  ;;  %1584 = vmatpush.bf16.msrb.mxu2 %v3535_v42  ;;  %v3391_v54 = vor.u32 %v4086_v47, %v3390_v45  ;;  %v2688_v45 = vld [vmem:[#allocation5 + $0x50] sm:$0xf0] }
  0x43   :  { %v3246_v53 = vld [vmem:[#allocation5 + $0x4a0] sm:$0xf]  ;;  %v3519_v55 = vor.u32 %v4118_v49, %v3518_v48  ;;  %v4050_v56 = vld [vmem:[#allocation5 + $0x4ac] sm:$0xf0]  ;;  %1597 = vmatpush.bf16.msrb.mxu3 %v2771_v46  ;;  %v3988_v32 = vld [vmem:[#allocation5 + $0x2c4] sm:$0xf] }
  0x44   :  { %v3374_v57 = vld [vmem:[#allocation5 + $0x5a0] sm:$0xf]  ;;  %v124_v58 = vld [vmem:[#allocation2 + $0x8] sm:$0xff]  ;;  %1559 = vmatpush.bf16.msrb.mxu0 %v3263_v52  ;;  %v3247_v3 = vor.u32 %v4050_v56, %v3246_v53  ;;  %v2691_v52 = vor.u32 %v3908_v44, %v2688_v45  ;;  %v3904_v56 = vld [vmem:[#allocation5 + $0x24] sm:$0xf] }
  0x45   :  { %v4082_v60 = vld [vmem:[#allocation5 + $0x5ac] sm:$0xf0]  ;;  %v3502_v61 = vld [vmem:[#allocation5 + $0x6a0] sm:$0xf]  ;;  %v367_v63 = vunpack.c.l.b16 %v124_v58  ;;  %v368_v0 = vunpack.c.h.b16 %v124_v58  ;;  %1572 = vmatpush.bf16.msrb.mxu1 %v3391_v54  ;;  %v3952_v45 = vld [vmem:[#allocation5 + $0x1a4] sm:$0xf] }
  0x46   :  { %v4114_v62 = vld [vmem:[#allocation5 + $0x6ac] sm:$0xf0]  ;;  %1585 = vmatpush.bf16.msrb.mxu2 %v3519_v55  ;;  %v3375_v7 = vor.u32 %v4082_v60, %v3374_v57  ;;  %v3230_v9 = vld [vmem:[#allocation5 + $0x480] sm:$0xf]  ;;  %v2672_v57 = vld [vmem:[#allocation5 + $0x30] sm:$0xf0] }
  0x47   :  { %v4486_v4 = vpack.c.b16 %v367_v63, %v367_v63  ;;  %v4488_v6 = vpack.c.b16 %v368_v0, %v368_v0  ;;  %v3503_v8 = vor.u32 %v4114_v62, %v3502_v61  ;;  %v4046_v10 = vld [vmem:[#allocation5 + $0x48c] sm:$0xf0]  ;;  %v3358_v11 = vld [vmem:[#allocation5 + $0x580] sm:$0xf]  ;;  %1598 = vmatpush.bf16.msrb.mxu3 %v2755_v59  ;;  %v2675_v5 = vor.u32 %v3904_v56, %v2672_v57  ;;  %v3948_v57 = vld [vmem:[#allocation5 + $0x184] sm:$0xf] }
  0x48   :  { %v4078_v15 = vld [vmem:[#allocation5 + $0x58c] sm:$0xf0]  ;;  %v3486_v16 = vld [vmem:[#allocation5 + $0x680] sm:$0xf]  ;;  %1560 = vmatpush.bf16.msrb.mxu0 %v3247_v3  ;;  %v3231_v22 = vor.u32 %v4046_v10, %v3230_v9  ;;  %v126_v3 = vld [vmem:[#allocation2 + $0x18] sm:$0xf] }
  0x49   :  { %v4110_v17 = vld [vmem:[#allocation5 + $0x68c] sm:$0xf0]  ;;  %1540 = vmatmul.bf16.vlgmr.msra.gmra.mxu2 %v4486_v4  ;;  %1553 = vmatmul.bf16.vlgmr.msra.gmra.mxu3 %v4488_v6  ;;  %v3359_v23 = vor.u32 %v4078_v15, %v3358_v11  ;;  %v3214_v25 = vld [vmem:[#allocation5 + $0x460] sm:$0xf]  ;;  %v125_v9 = vld [vmem:[#allocation2 + $0x10] sm:$0xff] }
  0x4a   :  { %1573 = vmatpush.bf16.msrb.mxu1 %v3375_v7  ;;  %1586 = vmatpush.bf16.msrb.mxu2 %v3503_v8  ;;  %v3487_v24 = vor.u32 %v4110_v17, %v3486_v16  ;;  %v4042_v26 = vld [vmem:[#allocation5 + $0x46c] sm:$0xf0]  ;;  %v3342_v27 = vld [vmem:[#allocation5 + $0x560] sm:$0xf]  ;;  %v3900_v7 = vld [vmem:[#allocation5 + $0x4] sm:$0xf]  ;;  %v371_v17 = vunpack.c.l.b16 %v126_v3 }
  0x4b   :  { %1599 = vmatpush.bf16.msrb.mxu3 %v2739_v14  ;;  %v4074_v29 = vld [vmem:[#allocation5 + $0x56c] sm:$0xf0]  ;;  %v3470_v30 = vld [vmem:[#allocation5 + $0x660] sm:$0xf]  ;;  %v3215_v34 = vor.u32 %v4042_v26, %v3214_v25  ;;  %v2656_v8 = vld [vmem:[#allocation5 + $0x10] sm:$0xf0]  ;;  %v370_v25 = vunpack.c.h.b16 %v125_v9 }
  0x4c   :  { %v4106_v31 = vld [vmem:[#allocation5 + $0x66c] sm:$0xf0]  ;;  %1561 = vmatpush.bf16.msrb.mxu0 %v3231_v22  ;;  %v3343_v35 = vor.u32 %v4074_v29, %v3342_v27  ;;  %v3198_v37 = vld [vmem:[#allocation5 + $0x440] sm:$0xf]  ;;  %v3960_v10 = vld [vmem:[#allocation5 + $0x1e4] sm:$0xf]  ;;  %v2659_v26 = vor.u32 %v3900_v7, %v2656_v8 }
  0x4d   :  { %v3471_v36 = vor.u32 %v4106_v31, %v3470_v30  ;;  %v4038_v38 = vld [vmem:[#allocation5 + $0x44c] sm:$0xf0]  ;;  %v3326_v39 = vld [vmem:[#allocation5 + $0x540] sm:$0xf]  ;;  %v2896_v11 = vld [vmem:[#allocation5 + $0x1f0] sm:$0xf0] }
  0x4e   :  { %1574 = vmatpush.bf16.msrb.mxu1 %v3359_v23  ;;  %1587 = vmatpush.bf16.msrb.mxu2 %v3487_v24  ;;  %v4070_v41 = vld [vmem:[#allocation5 + $0x54c] sm:$0xf0]  ;;  %v3454_v42 = vld [vmem:[#allocation5 + $0x640] sm:$0xf]  ;;  %v3199_v46 = vor.u32 %v4038_v38, %v3198_v37  ;;  %v3024_v14 = vld [vmem:[#allocation5 + $0x2f0] sm:$0xf0]  ;;  %v369_v24 = vunpack.c.l.b16 %v125_v9  ;;  %v2899_v27 = vor.u32 %v3960_v10, %v2896_v11  ;;  %v4498_v37 = vpack.c.b16 %v371_v17, %v371_v17 }
  0x4f   :  { %1600 = vmatpush.bf16.msrb.mxu3 %v2723_v28  ;;  %v4102_v43 = vld [vmem:[#allocation5 + $0x64c] sm:$0xf0]  ;;  %v3327_v47 = vor.u32 %v4070_v41, %v3326_v39  ;;  %v3182_v49 = vld [vmem:[#allocation5 + $0x420] sm:$0xf]  ;;  %v4024_v15 = vld [vmem:[#allocation5 + $0x3e4] sm:$0xf]  ;;  %v3027_v28 = vor.u32 %v3992_v12, %v3024_v14  ;;  %v4502_v41 = vpack.c.b16 %v370_v25, %v370_v25 }
  0x50   :  { %1562 = vmatpush.bf16.msrb.mxu0 %v3215_v34  ;;  %v3455_v48 = vor.u32 %v4102_v43, %v3454_v42  ;;  %v4034_v50 = vld [vmem:[#allocation5 + $0x42c] sm:$0xf0]  ;;  %v3310_v51 = vld [vmem:[#allocation5 + $0x520] sm:$0xf]  ;;  %v3152_v16 = vld [vmem:[#allocation5 + $0x3f0] sm:$0xf0] }
  0x51   :  { %v4066_v53 = vld [vmem:[#allocation5 + $0x52c] sm:$0xf0]  ;;  %v3438_v54 = vld [vmem:[#allocation5 + $0x620] sm:$0xf]  ;;  %v3183_v59 = vor.u32 %v4034_v50, %v3182_v49  ;;  %v4056_v22 = vld [vmem:[#allocation5 + $0x4e4] sm:$0xf]  ;;  %v3155_v29 = vor.u32 %v4024_v15, %v3152_v16 }
  0x52   :  { %1575 = vmatpush.bf16.msrb.mxu1 %v3343_v35  ;;  %1588 = vmatpush.bf16.msrb.mxu2 %v3471_v36  ;;  %v4098_v55 = vld [vmem:[#allocation5 + $0x62c] sm:$0xf0]  ;;  %v3166_v58 = vld [vmem:[#allocation5 + $0x400] sm:$0xf]  ;;  %v3311_v63 = vor.u32 %v4066_v53, %v3310_v51  ;;  %v3280_v23 = vld [vmem:[#allocation5 + $0x4f0] sm:$0xf0] }
  0x53   :  { %1601 = vmatpush.bf16.msrb.mxu3 %v2707_v40  ;;  %v4030_v60 = vld [vmem:[#allocation5 + $0x40c] sm:$0xf0]  ;;  %v3294_v61 = vld [vmem:[#allocation5 + $0x500] sm:$0xf]  ;;  %v3439_v0 = vor.u32 %v4098_v55, %v3438_v54  ;;  %v3956_v30 = vld [vmem:[#allocation5 + $0x1c4] sm:$0xf]  ;;  %v3283_v33 = vor.u32 %v4056_v22, %v3280_v23  ;;  %v4500_v40 = vpack.c.b16 %v369_v24, %v369_v24 }
  0x54   :  { %1563 = vmatpush.bf16.msrb.mxu0 %v3199_v46  ;;  %v4062_v62 = vld [vmem:[#allocation5 + $0x50c] sm:$0xf0]  ;;  %v3422_v1 = vld [vmem:[#allocation5 + $0x600] sm:$0xf]  ;;  %v3167_v13 = vor.u32 %v4030_v60, %v3166_v58  ;;  %v2880_v31 = vld [vmem:[#allocation5 + $0x1d0] sm:$0xf0] }
  0x55   :  { %v4094_v2 = vld [vmem:[#allocation5 + $0x60c] sm:$0xf0]  ;;  %v3295_v18 = vor.u32 %v4062_v62, %v3294_v61  ;;  %v3008_v34 = vld [vmem:[#allocation5 + $0x2d0] sm:$0xf0]  ;;  %v4020_v35 = vld [vmem:[#allocation5 + $0x3c4] sm:$0xf]  ;;  %v2883_v42 = vor.u32 %v3956_v30, %v2880_v31 }
  0x56   :  { %1576 = vmatpush.bf16.msrb.mxu1 %v3327_v47  ;;  %1589 = vmatpush.bf16.msrb.mxu2 %v3455_v48  ;;  %v3423_v19 = vor.u32 %v4094_v2, %v3422_v1  ;;  %v3136_v36 = vld [vmem:[#allocation5 + $0x3d0] sm:$0xf0]  ;;  %v4052_v38 = vld [vmem:[#allocation5 + $0x4c4] sm:$0xf]  ;;  %v3011_v43 = vor.u32 %v3988_v32, %v3008_v34 }
  0x57   :  { %1602 = vmatpush.bf16.msrb.mxu3 %v2691_v52  ;;  %v3264_v39 = vld [vmem:[#allocation5 + $0x4d0] sm:$0xf0]  ;;  %v3139_v44 = vor.u32 %v4020_v35, %v3136_v36  ;;  %v3984_v47 = vld [vmem:[#allocation5 + $0x2a4] sm:$0xf] }
  0x58   :  { %1564 = vmatpush.bf16.msrb.mxu0 %v3183_v59  ;;  %v2864_v46 = vld [vmem:[#allocation5 + $0x1b0] sm:$0xf0]  ;;  %v3267_v48 = vor.u32 %v4052_v38, %v3264_v39  ;;  %v4016_v50 = vld [vmem:[#allocation5 + $0x3a4] sm:$0xf] }
  0x59   :  { %v2992_v49 = vld [vmem:[#allocation5 + $0x2b0] sm:$0xf0]  ;;  %v4048_v52 = vld [vmem:[#allocation5 + $0x4a4] sm:$0xf]  ;;  %v2867_v54 = vor.u32 %v3952_v45, %v2864_v46 }
  0x5a   :  { %1577 = vmatpush.bf16.msrb.mxu1 %v3311_v63  ;;  %1590 = vmatpush.bf16.msrb.mxu2 %v3439_v0  ;;  %v3120_v51 = vld [vmem:[#allocation5 + $0x3b0] sm:$0xf0]  ;;  %v2995_v55 = vor.u32 %v3984_v47, %v2992_v49  ;;  %v3980_v59 = vld [vmem:[#allocation5 + $0x284] sm:$0xf] }
  0x5b   :  { %1603 = vmatpush.bf16.msrb.mxu3 %v2675_v5  ;;  %v3248_v53 = vld [vmem:[#allocation5 + $0x4b0] sm:$0xf0]  ;;  %v3123_v56 = vor.u32 %v4016_v50, %v3120_v51  ;;  %v4012_v62 = vld [vmem:[#allocation5 + $0x384] sm:$0xf] }
  0x5c   :  { %1565 = vmatpush.bf16.msrb.mxu0 %v3167_v13  ;;  %v2848_v58 = vld [vmem:[#allocation5 + $0x190] sm:$0xf0]  ;;  %v3251_v60 = vor.u32 %v4048_v52, %v3248_v53  ;;  %v4044_v0 = vld [vmem:[#allocation5 + $0x484] sm:$0xf] }
  0x5d   :  { %v2976_v61 = vld [vmem:[#allocation5 + $0x290] sm:$0xf0]  ;;  %v2851_v2 = vor.u32 %v3948_v57, %v2848_v58  ;;  %v3944_v7 = vld [vmem:[#allocation5 + $0x164] sm:$0xf] }
  0x5e   :  { %1578 = vmatpush.bf16.msrb.mxu1 %v3295_v18  ;;  %1591 = vmatpush.bf16.msrb.mxu2 %v3423_v19  ;;  %v3104_v63 = vld [vmem:[#allocation5 + $0x390] sm:$0xf0]  ;;  %v2979_v3 = vor.u32 %v3980_v59, %v2976_v61  ;;  %v3976_v9 = vld [vmem:[#allocation5 + $0x264] sm:$0xf] }
  0x5f   :  { %1604 = vmatpush.bf16.msrb.mxu3 %v2659_v26  ;;  %1566 = vmatmul.bf16.vlgmr.msrb.gmra.mxu0 %v4500_v40  ;;  %v3232_v1 = vld [vmem:[#allocation5 + $0x490] sm:$0xf0]  ;;  %v3107_v5 = vor.u32 %v4012_v62, %v3104_v63  ;;  %v4008_v12 = vld [vmem:[#allocation5 + $0x364] sm:$0xf]  ;;  %v2774_v62 = vld [vmem:[#allocation5 + $0xe8] sm:$0xf] }
  0x60   :  { %1610 = vmatpush.bf16.msra.mxu0 %v2899_v27  ;;  %v2832_v8 = vld [vmem:[#allocation5 + $0x170] sm:$0xf0]  ;;  %v3235_v10 = vor.u32 %v4044_v0, %v3232_v1  ;;  %v4040_v14 = vld [vmem:[#allocation5 + $0x464] sm:$0xf]  ;;  %v3931_v63 = vld [vmem:[#allocation5 + $0xf4] sm:$0xf0] }
  0x61   :  { %1592 = vmatmul.bf16.vlgmr.msrb.gmra.mxu2 %v4498_v37  ;;  %1579 = vmatmul.bf16.vlgmr.msrb.gmra.mxu1 %v4502_v41  ;;  %v2960_v11 = vld [vmem:[#allocation5 + $0x270] sm:$0xf0]  ;;  %v2835_v16 = vor.u32 %v3944_v7, %v2832_v8  ;;  %v3940_v19 = vld [vmem:[#allocation5 + $0x144] sm:$0xf] }
  0x62   :  { %1623 = vmatpush.bf16.msra.mxu1 %v3027_v28  ;;  %1636 = vmatpush.bf16.msra.mxu2 %v3155_v29  ;;  %v3088_v13 = vld [vmem:[#allocation5 + $0x370] sm:$0xf0]  ;;  %v2963_v17 = vor.u32 %v3976_v9, %v2960_v11  ;;  %v3972_v23 = vld [vmem:[#allocation5 + $0x244] sm:$0xf]  ;;  %v2775_v9 = vor.u32 %v3931_v63, %v2774_v62 }
  0x63   :  { %1649 = vmatpush.bf16.msra.mxu3 %v3283_v33  ;;  %v3216_v15 = vld [vmem:[#allocation5 + $0x470] sm:$0xf0]  ;;  %v3091_v18 = vor.u32 %v4008_v12, %v3088_v13  ;;  %v4004_v26 = vld [vmem:[#allocation5 + $0x344] sm:$0xf] }
  0x64   :  { %1611 = vmatpush.bf16.msra.mxu0 %v2883_v42  ;;  %1605 = vmatmul.bf16.vlgmr.msrb.gmra.mxu3 %v4491_v20  ;;  %v2816_v22 = vld [vmem:[#allocation5 + $0x150] sm:$0xf0]  ;;  %v3219_v24 = vor.u32 %v4040_v14, %v3216_v15  ;;  %v4036_v28 = vld [vmem:[#allocation5 + $0x444] sm:$0xf]  ;;  %v2758_v15 = vld [vmem:[#allocation5 + $0xc8] sm:$0xf] }
  0x65   :  { %v2944_v25 = vld [vmem:[#allocation5 + $0x250] sm:$0xf0]  ;;  %v2819_v30 = vor.u32 %v3940_v19, %v2816_v22  ;;  %v3936_v33 = vld [vmem:[#allocation5 + $0x124] sm:$0xf] }
  0x66   :  { %1624 = vmatpush.bf16.msra.mxu1 %v3011_v43  ;;  %1637 = vmatpush.bf16.msra.mxu2 %v3139_v44  ;;  %v3072_v27 = vld [vmem:[#allocation5 + $0x350] sm:$0xf0]  ;;  %v2947_v31 = vor.u32 %v3972_v23, %v2944_v25  ;;  %v3968_v35 = vld [vmem:[#allocation5 + $0x224] sm:$0xf] }
  0x67   :  { %1650 = vmatpush.bf16.msra.mxu3 %v3267_v48  ;;  %v3200_v29 = vld [vmem:[#allocation5 + $0x450] sm:$0xf0]  ;;  %v3075_v32 = vor.u32 %v4004_v26, %v3072_v27  ;;  %v4000_v39 = vld [vmem:[#allocation5 + $0x324] sm:$0xf] }
  0x68   :  { %1612 = vmatpush.bf16.msra.mxu0 %v2867_v54  ;;  %v2800_v34 = vld [vmem:[#allocation5 + $0x130] sm:$0xf0]  ;;  %v3203_v36 = vor.u32 %v4036_v28, %v3200_v29  ;;  %v4032_v43 = vld [vmem:[#allocation5 + $0x424] sm:$0xf]  ;;  %v2742_v29 = vld [vmem:[#allocation5 + $0xa8] sm:$0xf] }
  0x69   :  { %v2928_v38 = vld [vmem:[#allocation5 + $0x230] sm:$0xf0]  ;;  %v2803_v45 = vor.u32 %v3936_v33, %v2800_v34  ;;  %v3932_v46 = vld [vmem:[#allocation5 + $0x104] sm:$0xf] }
  0x6a   :  { %1625 = vmatpush.bf16.msra.mxu1 %v2995_v55  ;;  %1638 = vmatpush.bf16.msra.mxu2 %v3123_v56  ;;  %v3056_v42 = vld [vmem:[#allocation5 + $0x330] sm:$0xf0]  ;;  %v2931_v48 = vor.u32 %v3968_v35, %v2928_v38  ;;  %v3964_v50 = vld [vmem:[#allocation5 + $0x204] sm:$0xf] }
  0x6b   :  { %1651 = vmatpush.bf16.msra.mxu3 %v3251_v60  ;;  %v3184_v44 = vld [vmem:[#allocation5 + $0x430] sm:$0xf0]  ;;  %v3059_v49 = vor.u32 %v4000_v39, %v3056_v42  ;;  %v3996_v52 = vld [vmem:[#allocation5 + $0x304] sm:$0xf] }
  0x6c   :  { %1613 = vmatpush.bf16.msra.mxu0 %v2851_v2  ;;  %v2784_v47 = vld [vmem:[#allocation5 + $0x110] sm:$0xf0]  ;;  %v3187_v53 = vor.u32 %v4032_v43, %v3184_v44  ;;  %v4028_v55 = vld [vmem:[#allocation5 + $0x404] sm:$0xf]  ;;  %v2902_v2 = vld [vmem:[#allocation5 + $0x1e8] sm:$0xf] }
  0x6d   :  { %v2912_v51 = vld [vmem:[#allocation5 + $0x210] sm:$0xf0]  ;;  %v4088_v57 = vld [vmem:[#allocation5 + $0x5e4] sm:$0xf]  ;;  %v2787_v60 = vor.u32 %v3932_v46, %v2784_v47  ;;  %v2726_v44 = vld [vmem:[#allocation5 + $0x88] sm:$0xf] }
  0x6e   :  { %1626 = vmatpush.bf16.msra.mxu1 %v2979_v3  ;;  %1639 = vmatpush.bf16.msra.mxu2 %v3107_v5  ;;  %v3040_v54 = vld [vmem:[#allocation5 + $0x310] sm:$0xf0]  ;;  %v4120_v59 = vld [vmem:[#allocation5 + $0x6e4] sm:$0xf]  ;;  %v2915_v0 = vor.u32 %v3964_v50, %v2912_v51  ;;  %v3963_v3 = vld [vmem:[#allocation5 + $0x1f4] sm:$0xf0] }
  0x6f   :  { %1652 = vmatpush.bf16.msra.mxu3 %v3235_v10  ;;  %v3168_v56 = vld [vmem:[#allocation5 + $0x410] sm:$0xf0]  ;;  %v3043_v1 = vor.u32 %v3996_v52, %v3040_v54  ;;  %v4084_v10 = vld [vmem:[#allocation5 + $0x5c4] sm:$0xf]  ;;  %v2903_v13 = vor.u32 %v3963_v3, %v2902_v2  ;;  %v2854_v46 = vld [vmem:[#allocation5 + $0x188] sm:$0xf] }
  0x70   :  { %1614 = vmatpush.bf16.msra.mxu0 %v2835_v16  ;;  %v3408_v58 = vld [vmem:[#allocation5 + $0x5f0] sm:$0xf0]  ;;  %v3171_v5 = vor.u32 %v4028_v55, %v3168_v56  ;;  %v4116_v12 = vld [vmem:[#allocation5 + $0x6c4] sm:$0xf]  ;;  %v3927_v16 = vld [vmem:[#allocation5 + $0xd4] sm:$0xf0] }
  0x71   :  { %v3536_v61 = vld [vmem:[#allocation5 + $0x6f0] sm:$0xf0]  ;;  %v3411_v7 = vor.u32 %v4088_v57, %v3408_v58  ;;  %v2759_v23 = vor.u32 %v3927_v16, %v2758_v15  ;;  %v4112_v26 = vld [vmem:[#allocation5 + $0x6a4] sm:$0xf]  ;;  %v3951_v47 = vld [vmem:[#allocation5 + $0x194] sm:$0xf0] }
  0x72   :  { %1627 = vmatpush.bf16.msra.mxu1 %v2963_v17  ;;  %1640 = vmatpush.bf16.msra.mxu2 %v3091_v18  ;;  %v3539_v8 = vor.u32 %v4120_v59, %v3536_v61  ;;  %v3392_v11 = vld [vmem:[#allocation5 + $0x5d0] sm:$0xf0]  ;;  %v2886_v17 = vld [vmem:[#allocation5 + $0x1c8] sm:$0xf]  ;;  %v3959_v18 = vld [vmem:[#allocation5 + $0x1d4] sm:$0xf0]  ;;  %v2855_v54 = vor.u32 %v3951_v47, %v2854_v46 }
  0x73   :  { %1653 = vmatpush.bf16.msra.mxu3 %v3219_v24  ;;  %v3520_v14 = vld [vmem:[#allocation5 + $0x6d0] sm:$0xf0]  ;;  %v3395_v19 = vor.u32 %v4084_v10, %v3392_v11  ;;  %v4080_v24 = vld [vmem:[#allocation5 + $0x5a4] sm:$0xf]  ;;  %v2887_v27 = vor.u32 %v3959_v18, %v2886_v17  ;;  %v2710_v56 = vld [vmem:[#allocation5 + $0x68] sm:$0xf] }
  0x74   :  { %1615 = vmatpush.bf16.msra.mxu0 %v2819_v30  ;;  %v3523_v22 = vor.u32 %v4116_v12, %v3520_v14  ;;  %v3376_v25 = vld [vmem:[#allocation5 + $0x5b0] sm:$0xf0]  ;;  %v3923_v30 = vld [vmem:[#allocation5 + $0xb4] sm:$0xf0]  ;;  %v4108_v39 = vld [vmem:[#allocation5 + $0x684] sm:$0xf] }
  0x75   :  { %v3504_v28 = vld [vmem:[#allocation5 + $0x6b0] sm:$0xf0]  ;;  %v3379_v33 = vor.u32 %v4080_v24, %v3376_v25  ;;  %v2743_v35 = vor.u32 %v3923_v30, %v2742_v29  ;;  %v4072_v51 = vld [vmem:[#allocation5 + $0x564] sm:$0xf]  ;;  %v3915_v57 = vld [vmem:[#allocation5 + $0x74] sm:$0xf0] }
  0x76   :  { %1628 = vmatpush.bf16.msra.mxu1 %v2947_v31  ;;  %1641 = vmatpush.bf16.msra.mxu2 %v3075_v32  ;;  %v2870_v31 = vld [vmem:[#allocation5 + $0x1a8] sm:$0xf]  ;;  %v3955_v32 = vld [vmem:[#allocation5 + $0x1b4] sm:$0xf0]  ;;  %v3507_v34 = vor.u32 %v4112_v26, %v3504_v28  ;;  %v3360_v38 = vld [vmem:[#allocation5 + $0x590] sm:$0xf0]  ;;  %v2711_v62 = vor.u32 %v3915_v57, %v2710_v56 }
  0x77   :  { %1654 = vmatpush.bf16.msra.mxu3 %v3203_v36  ;;  %v4076_v36 = vld [vmem:[#allocation5 + $0x584] sm:$0xf]  ;;  %v2871_v42 = vor.u32 %v3955_v32, %v2870_v31  ;;  %v3488_v43 = vld [vmem:[#allocation5 + $0x690] sm:$0xf0]  ;;  %v2838_v58 = vld [vmem:[#allocation5 + $0x168] sm:$0xf] }
  0x78   :  { %1616 = vmatpush.bf16.msra.mxu0 %v2803_v45  ;;  %v3919_v45 = vld [vmem:[#allocation5 + $0x94] sm:$0xf0]  ;;  %v3344_v52 = vld [vmem:[#allocation5 + $0x570] sm:$0xf0]  ;;  %v4068_v63 = vld [vmem:[#allocation5 + $0x544] sm:$0xf] }
  0x79   :  { %v2727_v50 = vor.u32 %v3919_v45, %v2726_v44  ;;  %v3472_v55 = vld [vmem:[#allocation5 + $0x670] sm:$0xf0]  ;;  %v3947_v59 = vld [vmem:[#allocation5 + $0x174] sm:$0xf0]  ;;  %v4096_v15 = vld [vmem:[#allocation5 + $0x624] sm:$0xf] }
  0x7a   :  { %1629 = vmatpush.bf16.msra.mxu1 %v2931_v48  ;;  %1642 = vmatpush.bf16.msra.mxu2 %v3059_v49  ;;  %v3363_v48 = vor.u32 %v4076_v36, %v3360_v38  ;;  %v3491_v49 = vor.u32 %v4108_v39, %v3488_v43  ;;  %v2839_v2 = vor.u32 %v3947_v59, %v2838_v58  ;;  %v3456_v3 = vld [vmem:[#allocation5 + $0x650] sm:$0xf0]  ;;  %v2678_v18 = vld [vmem:[#allocation5 + $0x28] sm:$0xf]  ;;  %v4060_v25 = vld [vmem:[#allocation5 + $0x504] sm:$0xf] }
  0x7b   :  { %1655 = vmatpush.bf16.msra.mxu3 %v3187_v53  ;;  %v4104_v53 = vld [vmem:[#allocation5 + $0x664] sm:$0xf]  ;;  %v3312_v14 = vld [vmem:[#allocation5 + $0x530] sm:$0xf0]  ;;  %v2662_v31 = vld [vmem:[#allocation5 + $0x8] sm:$0xf] }
  0x7c   :  { %1617 = vmatpush.bf16.msra.mxu0 %v2787_v60  ;;  %v3347_v60 = vor.u32 %v4072_v51, %v3344_v52  ;;  %v3475_v61 = vor.u32 %v4104_v53, %v3472_v55  ;;  %v3440_v17 = vld [vmem:[#allocation5 + $0x630] sm:$0xf0]  ;;  %v4092_v29 = vld [vmem:[#allocation5 + $0x604] sm:$0xf]  ;;  %v3030_v36 = vld [vmem:[#allocation5 + $0x2e8] sm:$0xf] }
  0x7d   :  { %v3296_v26 = vld [vmem:[#allocation5 + $0x510] sm:$0xf0]  ;;  %v3995_v38 = vld [vmem:[#allocation5 + $0x2f4] sm:$0xf0]  ;;  %v3158_v39 = vld [vmem:[#allocation5 + $0x3e8] sm:$0xf] }
  0x7e   :  { %1630 = vmatpush.bf16.msra.mxu1 %v2915_v0  ;;  %1643 = vmatpush.bf16.msra.mxu2 %v3043_v1  ;;  %v3328_v0 = vld [vmem:[#allocation5 + $0x550] sm:$0xf0]  ;;  %v4100_v1 = vld [vmem:[#allocation5 + $0x644] sm:$0xf]  ;;  %v4027_v43 = vld [vmem:[#allocation5 + $0x3f4] sm:$0xf0]  ;;  %v3031_v51 = vor.u32 %v3995_v38, %v3030_v36 }
  0x7f   :  { %1656 = vmatpush.bf16.msra.mxu3 %v3171_v5  ;;  %1618 = vmatmul.bf16.vlgmr.msra.gmra.mxu0 %v4493_v21  ;;  %v2694_v5 = vld [vmem:[#allocation5 + $0x48] sm:$0xf]  ;;  %v3331_v10 = vor.u32 %v4068_v63, %v3328_v0  ;;  %v3459_v11 = vor.u32 %v4100_v1, %v3456_v3  ;;  %v3424_v30 = vld [vmem:[#allocation5 + $0x610] sm:$0xf0]  ;;  %v4059_v45 = vld [vmem:[#allocation5 + $0x4f4] sm:$0xf0]  ;;  %v3159_v52 = vor.u32 %v4027_v43, %v3158_v39 }
  0x80   :  { %1662 = vmatpush.bf16.msrb.mxu0 %v3411_v7  ;;  %v3911_v7 = vld [vmem:[#allocation5 + $0x54] sm:$0xf0]  ;;  %v3286_v44 = vld [vmem:[#allocation5 + $0x4e8] sm:$0xf]  ;;  %v3427_v46 = vor.u32 %v4092_v29, %v3424_v30 }
  0x81   :  { %1644 = vmatmul.bf16.vlgmr.msra.gmra.mxu2 %v4488_v6  ;;  %1631 = vmatmul.bf16.vlgmr.msra.gmra.mxu1 %v4486_v4  ;;  %v2695_v12 = vor.u32 %v3911_v7, %v2694_v5  ;;  %v3287_v53 = vor.u32 %v4059_v45, %v3286_v44  ;;  %v3991_v55 = vld [vmem:[#allocation5 + $0x2d4] sm:$0xf0]  ;;  %v3142_v56 = vld [vmem:[#allocation5 + $0x3c8] sm:$0xf] }
  0x82   :  { %1675 = vmatpush.bf16.msrb.mxu1 %v3539_v8  ;;  %1688 = vmatpush.bf16.msrb.mxu2 %v2775_v9  ;;  %v2822_v8 = vld [vmem:[#allocation5 + $0x148] sm:$0xf]  ;;  %v3943_v9 = vld [vmem:[#allocation5 + $0x154] sm:$0xf0] }
  0x83   :  { %1701 = vmatpush.bf16.msrb.mxu3 %v2903_v13  ;;  %v4064_v13 = vld [vmem:[#allocation5 + $0x524] sm:$0xf]  ;;  %v2823_v16 = vor.u32 %v3943_v9, %v2822_v8  ;;  %v4023_v58 = vld [vmem:[#allocation5 + $0x3d4] sm:$0xf0]  ;;  %v3270_v59 = vld [vmem:[#allocation5 + $0x4c8] sm:$0xf] }
  0x84   :  { %1657 = vmatmul.bf16.vlgmr.msra.gmra.mxu3 %v4500_v40  ;;  %1663 = vmatpush.bf16.msrb.mxu0 %v3395_v19  ;;  %v3907_v19 = vld [vmem:[#allocation5 + $0x34] sm:$0xf0]  ;;  %v3315_v24 = vor.u32 %v4064_v13, %v3312_v14  ;;  %v3143_v0 = vor.u32 %v4023_v58, %v3142_v56  ;;  %v3126_v5 = vld [vmem:[#allocation5 + $0x3a8] sm:$0xf] }
  0x85   :  { %v2679_v28 = vor.u32 %v3907_v19, %v2678_v18  ;;  %v3987_v3 = vld [vmem:[#allocation5 + $0x2b4] sm:$0xf0]  ;;  %v3254_v9 = vld [vmem:[#allocation5 + $0x4a8] sm:$0xf] }
  0x86   :  { %1676 = vmatpush.bf16.msrb.mxu1 %v3523_v22  ;;  %1689 = vmatpush.bf16.msrb.mxu2 %v2759_v23  ;;  %v2806_v22 = vld [vmem:[#allocation5 + $0x128] sm:$0xf]  ;;  %v3939_v23 = vld [vmem:[#allocation5 + $0x134] sm:$0xf0] }
  0x87   :  { %1702 = vmatpush.bf16.msrb.mxu3 %v2887_v27  ;;  %v3443_v27 = vor.u32 %v4096_v15, %v3440_v17  ;;  %v2807_v32 = vor.u32 %v3939_v23, %v2806_v22  ;;  %v4019_v8 = vld [vmem:[#allocation5 + $0x3b4] sm:$0xf0]  ;;  %v3110_v18 = vld [vmem:[#allocation5 + $0x388] sm:$0xf] }
  0x88   :  { %1664 = vmatpush.bf16.msrb.mxu0 %v3379_v33  ;;  %v3903_v33 = vld [vmem:[#allocation5 + $0x14] sm:$0xf0]  ;;  %v3127_v14 = vor.u32 %v4019_v8, %v3126_v5  ;;  %v3238_v23 = vld [vmem:[#allocation5 + $0x488] sm:$0xf] }
  0x89   :  { %v2663_v47 = vor.u32 %v3903_v33, %v2662_v31  ;;  %v3983_v17 = vld [vmem:[#allocation5 + $0x294] sm:$0xf0]  ;;  %v2966_v30 = vld [vmem:[#allocation5 + $0x268] sm:$0xf] }
  0x8a   :  { %1677 = vmatpush.bf16.msrb.mxu1 %v3507_v34  ;;  %1690 = vmatpush.bf16.msrb.mxu2 %v2743_v35  ;;  %v2790_v34 = vld [vmem:[#allocation5 + $0x108] sm:$0xf]  ;;  %v3935_v35 = vld [vmem:[#allocation5 + $0x114] sm:$0xf0] }
  0x8b   :  { %1703 = vmatpush.bf16.msrb.mxu3 %v2871_v42  ;;  %v3299_v42 = vor.u32 %v4060_v25, %v3296_v26  ;;  %v4015_v22 = vld [vmem:[#allocation5 + $0x394] sm:$0xf0]  ;;  %v3366_v25 = vld [vmem:[#allocation5 + $0x588] sm:$0xf] }
  0x8c   :  { %1665 = vmatpush.bf16.msrb.mxu0 %v3363_v48  ;;  %v3414_v48 = vld [vmem:[#allocation5 + $0x5e8] sm:$0xf]  ;;  %v4079_v26 = vld [vmem:[#allocation5 + $0x594] sm:$0xf0] }
  0x8d   :  { %v3979_v31 = vld [vmem:[#allocation5 + $0x274] sm:$0xf0]  ;;  %v3367_v33 = vor.u32 %v4079_v26, %v3366_v25  ;;  %v3350_v38 = vld [vmem:[#allocation5 + $0x568] sm:$0xf] }
  0x8e   :  { %1678 = vmatpush.bf16.msrb.mxu1 %v3491_v49  ;;  %1691 = vmatpush.bf16.msrb.mxu2 %v2727_v50  ;;  %v4091_v49 = vld [vmem:[#allocation5 + $0x5f4] sm:$0xf0]  ;;  %v2791_v50 = vor.u32 %v3935_v35, %v2790_v34  ;;  %v3222_v35 = vld [vmem:[#allocation5 + $0x468] sm:$0xf] }
  0x8f   :  { %1704 = vmatpush.bf16.msrb.mxu3 %v2855_v54  ;;  %v3014_v54 = vld [vmem:[#allocation5 + $0x2c8] sm:$0xf]  ;;  %v3415_v57 = vor.u32 %v4091_v49, %v3414_v48  ;;  %v4011_v34 = vld [vmem:[#allocation5 + $0x374] sm:$0xf0] }
  0x90   :  { %1666 = vmatpush.bf16.msrb.mxu0 %v3347_v60  ;;  %v4055_v60 = vld [vmem:[#allocation5 + $0x4d4] sm:$0xf0]  ;;  %v3015_v63 = vor.u32 %v3991_v55, %v3014_v54  ;;  %v2950_v45 = vld [vmem:[#allocation5 + $0x248] sm:$0xf] }
  0x91   :  { %v3271_v1 = vor.u32 %v4055_v60, %v3270_v59  ;;  %v4043_v36 = vld [vmem:[#allocation5 + $0x474] sm:$0xf0]  ;;  %v3062_v59 = vld [vmem:[#allocation5 + $0x328] sm:$0xf] }
  0x92   :  { %1679 = vmatpush.bf16.msrb.mxu1 %v3475_v61  ;;  %1692 = vmatpush.bf16.msrb.mxu2 %v2711_v62  ;;  %v3398_v61 = vld [vmem:[#allocation5 + $0x5c8] sm:$0xf]  ;;  %v4087_v62 = vld [vmem:[#allocation5 + $0x5d4] sm:$0xf0]  ;;  %v3223_v44 = vor.u32 %v4043_v36, %v3222_v35  ;;  %v3925_v35 = vld [vmem:[#allocation5 + $0xcc] sm:$0xf] }
  0x93   :  { %1705 = vmatpush.bf16.msrb.mxu3 %v2839_v2  ;;  %v2998_v2 = vld [vmem:[#allocation5 + $0x2a8] sm:$0xf]  ;;  %v3399_v7 = vor.u32 %v4087_v62, %v3398_v61  ;;  %v4075_v39 = vld [vmem:[#allocation5 + $0x574] sm:$0xf0] }
  0x94   :  { %1667 = vmatpush.bf16.msrb.mxu0 %v3331_v10  ;;  %v4051_v10 = vld [vmem:[#allocation5 + $0x4b4] sm:$0xf0]  ;;  %v2999_v13 = vor.u32 %v3987_v3, %v2998_v2  ;;  %v3351_v48 = vor.u32 %v4075_v39, %v3350_v38  ;;  %v3190_v62 = vld [vmem:[#allocation5 + $0x428] sm:$0xf]  ;;  %v2760_v38 = vld [vmem:[#allocation5 + $0xd8] sm:$0xf0] }
  0x95   :  { %v3255_v15 = vor.u32 %v4051_v10, %v3254_v9  ;;  %v4007_v49 = vld [vmem:[#allocation5 + $0x354] sm:$0xf0]  ;;  %v2918_v3 = vld [vmem:[#allocation5 + $0x208] sm:$0xf]  ;;  %v3957_v39 = vld [vmem:[#allocation5 + $0x1cc] sm:$0xf] }
  0x96   :  { %1680 = vmatpush.bf16.msrb.mxu1 %v3459_v11  ;;  %1693 = vmatpush.bf16.msrb.mxu2 %v2695_v12  ;;  %v3382_v11 = vld [vmem:[#allocation5 + $0x5a8] sm:$0xf]  ;;  %v4083_v12 = vld [vmem:[#allocation5 + $0x5b4] sm:$0xf0] }
  0x97   :  { %1706 = vmatpush.bf16.msrb.mxu3 %v2823_v16  ;;  %v2982_v16 = vld [vmem:[#allocation5 + $0x288] sm:$0xf]  ;;  %v3383_v19 = vor.u32 %v4083_v12, %v3382_v11  ;;  %v3971_v58 = vld [vmem:[#allocation5 + $0x234] sm:$0xf0] }
  0x98   :  { %1668 = vmatpush.bf16.msrb.mxu0 %v3315_v24  ;;  %v4047_v24 = vld [vmem:[#allocation5 + $0x494] sm:$0xf0]  ;;  %v3046_v9 = vld [vmem:[#allocation5 + $0x308] sm:$0xf] }
  0x99   :  { %v3239_v29 = vor.u32 %v4047_v24, %v3238_v23  ;;  %v4003_v61 = vld [vmem:[#allocation5 + $0x334] sm:$0xf0]  ;;  %v3174_v11 = vld [vmem:[#allocation5 + $0x408] sm:$0xf]  ;;  %v3961_v23 = vld [vmem:[#allocation5 + $0x1ec] sm:$0xf] }
  0x9a   :  { %1681 = vmatpush.bf16.msrb.mxu1 %v3443_v27  ;;  %1694 = vmatpush.bf16.msrb.mxu2 %v2679_v28  ;;  %v2983_v27 = vor.u32 %v3983_v17, %v2982_v16  ;;  %v3111_v28 = vor.u32 %v4015_v22, %v3110_v18  ;;  %v3967_v5 = vld [vmem:[#allocation5 + $0x214] sm:$0xf0]  ;;  %v3542_v16 = vld [vmem:[#allocation5 + $0x6e8] sm:$0xf]  ;;  %v3929_v18 = vld [vmem:[#allocation5 + $0xec] sm:$0xf] }
  0x9b   :  { %1707 = vmatpush.bf16.msrb.mxu3 %v2807_v32  ;;  %v3094_v32 = vld [vmem:[#allocation5 + $0x368] sm:$0xf]  ;;  %v3999_v10 = vld [vmem:[#allocation5 + $0x314] sm:$0xf0]  ;;  %v2776_v22 = vld [vmem:[#allocation5 + $0xf8] sm:$0xf0] }
  0x9c   :  { %1669 = vmatpush.bf16.msrb.mxu0 %v3299_v42  ;;  %v2967_v42 = vor.u32 %v3979_v31, %v2966_v30  ;;  %v3095_v43 = vor.u32 %v4011_v34, %v3094_v32  ;;  %v4123_v17 = vld [vmem:[#allocation5 + $0x6f4] sm:$0xf0]  ;;  %v2904_v24 = vld [vmem:[#allocation5 + $0x1f8] sm:$0xf0]  ;;  %v3047_v25 = vor.u32 %v3999_v10, %v3046_v9  ;;  %v2779_v31 = vor.u32 %v3929_v18, %v2776_v22  ;;  %v3478_v10 = vld [vmem:[#allocation5 + $0x668] sm:$0xf] }
  0x9d   :  { %v3543_v30 = vor.u32 %v4123_v17, %v3542_v16  ;;  %v2907_v32 = vor.u32 %v3961_v23, %v2904_v24  ;;  %v4119_v34 = vld [vmem:[#allocation5 + $0x6d4] sm:$0xf0]  ;;  %v2840_v16 = vld [vmem:[#allocation5 + $0x178] sm:$0xf0]  ;;  %v3977_v17 = vld [vmem:[#allocation5 + $0x26c] sm:$0xf] }
  0x9e   :  { %1682 = vmatpush.bf16.msrb.mxu1 %v3427_v46  ;;  %1695 = vmatpush.bf16.msrb.mxu2 %v2663_v47  ;;  %v3975_v46 = vld [vmem:[#allocation5 + $0x254] sm:$0xf0]  ;;  %v3078_v47 = vld [vmem:[#allocation5 + $0x348] sm:$0xf]  ;;  %v2968_v18 = vld [vmem:[#allocation5 + $0x278] sm:$0xf0] }
  0x9f   :  { %1708 = vmatpush.bf16.msrb.mxu3 %v2791_v50  ;;  %1670 = vmatmul.bf16.vlgmr.msrb.gmra.mxu0 %v4502_v41  ;;  %v3206_v50 = vld [vmem:[#allocation5 + $0x448] sm:$0xf]  ;;  %v2951_v54 = vor.u32 %v3975_v46, %v2950_v45  ;;  %v3079_v55 = vor.u32 %v4007_v49, %v3078_v47  ;;  %v2763_v46 = vor.u32 %v3925_v35, %v2760_v38  ;;  %v4115_v49 = vld [vmem:[#allocation5 + $0x6b4] sm:$0xf0] }
  0xa0   :  { %1714 = vmatpush.bf16.msra.mxu0 %v3031_v51  ;;  %v4039_v51 = vld [vmem:[#allocation5 + $0x454] sm:$0xf0]  ;;  %v3462_v24 = vld [vmem:[#allocation5 + $0x648] sm:$0xf] }
  0xa1   :  { %1683 = vmatmul.bf16.vlgmr.msrb.gmra.mxu1 %v4498_v37  ;;  %1696 = vmatmul.bf16.vlgmr.msrb.gmra.mxu2 %v4491_v20  ;;  %v3207_v56 = vor.u32 %v4039_v51, %v3206_v50  ;;  %v3921_v50 = vld [vmem:[#allocation5 + $0xac] sm:$0xf] }
  0xa2   :  { %1727 = vmatpush.bf16.msra.mxu1 %v3159_v52  ;;  %1740 = vmatpush.bf16.msra.mxu2 %v3287_v53  ;;  %v3334_v52 = vld [vmem:[#allocation5 + $0x548] sm:$0xf]  ;;  %v4071_v53 = vld [vmem:[#allocation5 + $0x554] sm:$0xf0] }
  0xa3   :  { %1753 = vmatpush.bf16.msra.mxu3 %v3415_v57  ;;  %v2934_v57 = vld [vmem:[#allocation5 + $0x228] sm:$0xf]  ;;  %v3335_v60 = vor.u32 %v4071_v53, %v3334_v52  ;;  %v2744_v52 = vld [vmem:[#allocation5 + $0xb8] sm:$0xf0]  ;;  %v3953_v53 = vld [vmem:[#allocation5 + $0x1ac] sm:$0xf] }
  0xa4   :  { %1715 = vmatpush.bf16.msra.mxu0 %v3015_v63  ;;  %1709 = vmatmul.bf16.vlgmr.msrb.gmra.mxu3 %v4493_v21  ;;  %v4035_v63 = vld [vmem:[#allocation5 + $0x434] sm:$0xf0]  ;;  %v2935_v2 = vor.u32 %v3971_v58, %v2934_v57  ;;  %v2747_v58 = vor.u32 %v3921_v50, %v2744_v52  ;;  %v3969_v50 = vld [vmem:[#allocation5 + $0x22c] sm:$0xf] }
  0xa5   :  { %v3191_v8 = vor.u32 %v4035_v63, %v3190_v62  ;;  %v3917_v62 = vld [vmem:[#allocation5 + $0x8c] sm:$0xf] }
  0xa6   :  { %1728 = vmatpush.bf16.msra.mxu1 %v3143_v0  ;;  %1741 = vmatpush.bf16.msra.mxu2 %v3271_v1  ;;  %v3318_v0 = vld [vmem:[#allocation5 + $0x528] sm:$0xf]  ;;  %v4067_v1 = vld [vmem:[#allocation5 + $0x534] sm:$0xf0] }
  0xa7   :  { %1754 = vmatpush.bf16.msra.mxu3 %v3399_v7  ;;  %v3063_v7 = vor.u32 %v4003_v61, %v3062_v59  ;;  %v3319_v12 = vor.u32 %v4067_v1, %v3318_v0  ;;  %v4111_v61 = vld [vmem:[#allocation5 + $0x694] sm:$0xf0]  ;;  %v2728_v0 = vld [vmem:[#allocation5 + $0x98] sm:$0xf0]  ;;  %v3949_v1 = vld [vmem:[#allocation5 + $0x18c] sm:$0xf] }
  0xa8   :  { %1716 = vmatpush.bf16.msra.mxu0 %v2999_v13  ;;  %v4031_v13 = vld [vmem:[#allocation5 + $0x414] sm:$0xf0] }
  0xa9   :  { %v3175_v26 = vor.u32 %v4031_v13, %v3174_v11  ;;  %v4107_v11 = vld [vmem:[#allocation5 + $0x674] sm:$0xf0] }
  0xaa   :  { %1729 = vmatpush.bf16.msra.mxu1 %v3127_v14  ;;  %1742 = vmatpush.bf16.msra.mxu2 %v3255_v15  ;;  %v3302_v14 = vld [vmem:[#allocation5 + $0x508] sm:$0xf]  ;;  %v4063_v15 = vld [vmem:[#allocation5 + $0x514] sm:$0xf0] }
  0xab   :  { %1755 = vmatpush.bf16.msra.mxu3 %v3383_v19  ;;  %v2919_v19 = vor.u32 %v3967_v5, %v2918_v3  ;;  %v3981_v3 = vld [vmem:[#allocation5 + $0x28c] sm:$0xf]  ;;  %v2984_v5 = vld [vmem:[#allocation5 + $0x298] sm:$0xf0] }
  0xac   :  { %1717 = vmatpush.bf16.msra.mxu0 %v2983_v27  ;;  %v3993_v27 = vld [vmem:[#allocation5 + $0x2ec] sm:$0xf]  ;;  %v2987_v13 = vor.u32 %v3981_v3, %v2984_v5 }
  0xae   :  { %1730 = vmatpush.bf16.msra.mxu1 %v3111_v28  ;;  %1743 = vmatpush.bf16.msra.mxu2 %v3239_v29  ;;  %v3032_v28 = vld [vmem:[#allocation5 + $0x2f8] sm:$0xf0]  ;;  %v3303_v29 = vor.u32 %v4063_v15, %v3302_v14  ;;  %v3945_v15 = vld [vmem:[#allocation5 + $0x16c] sm:$0xf] }
  0xaf   :  { %1756 = vmatpush.bf16.msra.mxu3 %v3367_v33  ;;  %v3526_v33 = vld [vmem:[#allocation5 + $0x6c8] sm:$0xf]  ;;  %v3035_v36 = vor.u32 %v3993_v27, %v3032_v28  ;;  %v2712_v14 = vld [vmem:[#allocation5 + $0x78] sm:$0xf0]  ;;  %v2843_v23 = vor.u32 %v3945_v15, %v2840_v16  ;;  %v2971_v27 = vor.u32 %v3977_v17, %v2968_v18 }
  0xb0   :  { %1718 = vmatpush.bf16.msra.mxu0 %v2967_v42  ;;  %v2888_v42 = vld [vmem:[#allocation5 + $0x1d8] sm:$0xf0]  ;;  %v3527_v45 = vor.u32 %v4119_v34, %v3526_v33 }
  0xb1   :  { %v2891_v47 = vor.u32 %v3957_v39, %v2888_v42  ;;  %v2696_v28 = vld [vmem:[#allocation5 + $0x58] sm:$0xf0]  ;;  %v3446_v39 = vld [vmem:[#allocation5 + $0x628] sm:$0xf]  ;;  %v4099_v42 = vld [vmem:[#allocation5 + $0x634] sm:$0xf0] }
  0xb2   :  { %1731 = vmatpush.bf16.msra.mxu1 %v3095_v43  ;;  %1744 = vmatpush.bf16.msra.mxu2 %v3223_v44  ;;  %v3989_v43 = vld [vmem:[#allocation5 + $0x2cc] sm:$0xf]  ;;  %v3016_v44 = vld [vmem:[#allocation5 + $0x2d8] sm:$0xf0]  ;;  %v3447_v52 = vor.u32 %v4099_v42, %v3446_v39 }
  0xb3   :  { %1757 = vmatpush.bf16.msra.mxu3 %v3351_v48  ;;  %v3510_v48 = vld [vmem:[#allocation5 + $0x6a8] sm:$0xf]  ;;  %v3019_v51 = vor.u32 %v3989_v43, %v3016_v44  ;;  %v3905_v43 = vld [vmem:[#allocation5 + $0x2c] sm:$0xf]  ;;  %v3128_v39 = vld [vmem:[#allocation5 + $0x3b8] sm:$0xf0] }
  0xb4   :  { %1719 = vmatpush.bf16.msra.mxu0 %v2951_v54  ;;  %v2872_v54 = vld [vmem:[#allocation5 + $0x1b8] sm:$0xf0]  ;;  %v3511_v57 = vor.u32 %v4115_v49, %v3510_v48  ;;  %v4049_v42 = vld [vmem:[#allocation5 + $0x4ac] sm:$0xf] }
  0xb5   :  { %v2875_v59 = vor.u32 %v3953_v53, %v2872_v54  ;;  %v2808_v48 = vld [vmem:[#allocation5 + $0x138] sm:$0xf0]  ;;  %v3430_v53 = vld [vmem:[#allocation5 + $0x608] sm:$0xf]  ;;  %v4095_v54 = vld [vmem:[#allocation5 + $0x614] sm:$0xf0] }
  0xb6   :  { %1732 = vmatpush.bf16.msra.mxu1 %v3079_v55  ;;  %1745 = vmatpush.bf16.msra.mxu2 %v3207_v56  ;;  %v3985_v55 = vld [vmem:[#allocation5 + $0x2ac] sm:$0xf]  ;;  %v3000_v56 = vld [vmem:[#allocation5 + $0x2b8] sm:$0xf0]  ;;  %v3431_v5 = vor.u32 %v4095_v54, %v3430_v53 }
  0xb7   :  { %1758 = vmatpush.bf16.msra.mxu3 %v3335_v60  ;;  %v3494_v60 = vld [vmem:[#allocation5 + $0x688] sm:$0xf]  ;;  %v3003_v63 = vor.u32 %v3985_v55, %v3000_v56  ;;  %v4013_v54 = vld [vmem:[#allocation5 + $0x38c] sm:$0xf] }
  0xb8   :  { %1720 = vmatpush.bf16.msra.mxu0 %v2935_v2  ;;  %v2856_v2 = vld [vmem:[#allocation5 + $0x198] sm:$0xf0] }
  0xb9   :  { %v2859_v9 = vor.u32 %v3949_v1, %v2856_v2  ;;  %v3160_v1 = vld [vmem:[#allocation5 + $0x3f8] sm:$0xf0]  ;;  %v4057_v2 = vld [vmem:[#allocation5 + $0x4ec] sm:$0xf] }
  0xba   :  { %1733 = vmatpush.bf16.msra.mxu1 %v3063_v7  ;;  %1746 = vmatpush.bf16.msra.mxu2 %v3191_v8  ;;  %v3495_v7 = vor.u32 %v4111_v61, %v3494_v60  ;;  %v2731_v8 = vor.u32 %v3917_v62, %v2728_v0  ;;  %v2792_v61 = vld [vmem:[#allocation5 + $0x118] sm:$0xf0]  ;;  %v3965_v62 = vld [vmem:[#allocation5 + $0x20c] sm:$0xf] }
  0xbb   :  { %1759 = vmatpush.bf16.msra.mxu3 %v3319_v12  ;;  %v3913_v12 = vld [vmem:[#allocation5 + $0x6c] sm:$0xf] }
  0xbc   :  { %1721 = vmatpush.bf16.msra.mxu0 %v2919_v19  ;;  %v3479_v19 = vor.u32 %v4107_v11, %v3478_v10  ;;  %v2715_v22 = vor.u32 %v3913_v12, %v2712_v14  ;;  %v4520_v33 = vpop.f32.mrf.mxu0  ;;  %v4025_v0 = vld [vmem:[#allocation5 + $0x3ec] sm:$0xf]  ;;  %v3544_v14 = vld [vmem:[#allocation5 + $0x6f8] sm:$0xf0] }
  0xbd   :  { %v4522_v35 = vpop.f32.mrf.mxu1  ;;  %v3163_v17 = vor.u32 %v4025_v0, %v3160_v1  ;;  %v4009_v1 = vld [vmem:[#allocation5 + $0x36c] sm:$0xf] }
  0xbe   :  { %1734 = vmatpush.bf16.msra.mxu1 %v3047_v25  ;;  %1747 = vmatpush.bf16.msra.mxu2 %v3175_v26  ;;  %v4103_v25 = vld [vmem:[#allocation5 + $0x654] sm:$0xf0]  ;;  %v3909_v26 = vld [vmem:[#allocation5 + $0x4c] sm:$0xf] }
  0xbf   :  { %1760 = vmatpush.bf16.msra.mxu3 %v3303_v29  ;;  %1722 = vmatmul.bf16.vlgmr.msra.gmra.mxu0 %v4486_v4  ;;  %v3941_v29 = vld [vmem:[#allocation5 + $0x14c] sm:$0xf]  ;;  %v3463_v34 = vor.u32 %v4103_v25, %v3462_v24  ;;  %v3144_v24 = vld [vmem:[#allocation5 + $0x3d8] sm:$0xf0] }
  0xc0   :  { %1766 = vmatpush.bf16.msrb.mxu0 %v3543_v30  ;;  %v2824_v30 = vld [vmem:[#allocation5 + $0x158] sm:$0xf0]  ;;  %v4053_v25 = vld [vmem:[#allocation5 + $0x4cc] sm:$0xf] }
  0xc1   :  { %1748 = vmatmul.bf16.vlgmr.msra.gmra.mxu2 %v4500_v40  ;;  %1735 = vmatmul.bf16.vlgmr.msra.gmra.mxu1 %v4488_v6  ;;  %v2827_v38 = vor.u32 %v3941_v29, %v2824_v30  ;;  %v3400_v29 = vld [vmem:[#allocation5 + $0x5d8] sm:$0xf0]  ;;  %v4117_v30 = vld [vmem:[#allocation5 + $0x6cc] sm:$0xf] }
  0xc2   :  { %1779 = vmatpush.bf16.msrb.mxu1 %v2779_v31  ;;  %1792 = vmatpush.bf16.msrb.mxu2 %v2907_v32  ;;  %v3973_v31 = vld [vmem:[#allocation5 + $0x24c] sm:$0xf]  ;;  %v2952_v32 = vld [vmem:[#allocation5 + $0x258] sm:$0xf0] }
  0xc3   :  { %1805 = vmatpush.bf16.msrb.mxu3 %v3035_v36  ;;  %v2699_v36 = vor.u32 %v3909_v26, %v2696_v28  ;;  %v4085_v28 = vld [vmem:[#allocation5 + $0x5cc] sm:$0xf] }
  0xc4   :  { %1761 = vmatmul.bf16.vlgmr.msra.gmra.mxu3 %v4502_v41  ;;  %1767 = vmatpush.bf16.msrb.mxu0 %v3527_v45  ;;  %v2955_v45 = vor.u32 %v3973_v31, %v2952_v32  ;;  %v1517_v3 = vpop.f32.mrf.mxu0  ;;  %v3528_v31 = vld [vmem:[#allocation5 + $0x6d8] sm:$0xf0] }
  0xc5   :  { %v1530_v10 = vpop.f32.mrf.mxu1  ;;  %v4041_v3 = vld [vmem:[#allocation5 + $0x46c] sm:$0xf] }
  0xc6   :  { %1780 = vmatpush.bf16.msrb.mxu1 %v2763_v46  ;;  %1793 = vmatpush.bf16.msrb.mxu2 %v2891_v47  ;;  %v2680_v46 = vld [vmem:[#allocation5 + $0x38] sm:$0xf0]  ;;  %v3937_v47 = vld [vmem:[#allocation5 + $0x12c] sm:$0xf] }
  0xc7   :  { %1806 = vmatpush.bf16.msrb.mxu3 %v3019_v51  ;;  %v2936_v51 = vld [vmem:[#allocation5 + $0x238] sm:$0xf0]  ;;  %v2683_v55 = vor.u32 %v3905_v43, %v2680_v46  ;;  %v2811_v56 = vor.u32 %v3937_v47, %v2808_v48  ;;  %v3531_v43 = vor.u32 %v4117_v30, %v3528_v31  ;;  %v4081_v46 = vld [vmem:[#allocation5 + $0x5ac] sm:$0xf] }
  0xc8   :  { %1768 = vmatpush.bf16.msrb.mxu0 %v3511_v57  ;;  %v3901_v57 = vld [vmem:[#allocation5 + $0xc] sm:$0xf]  ;;  %v2939_v60 = vor.u32 %v3969_v50, %v2936_v51  ;;  %v3384_v47 = vld [vmem:[#allocation5 + $0x5b8] sm:$0xf0] }
  0xc9   :  { %v4113_v48 = vld [vmem:[#allocation5 + $0x6ac] sm:$0xf]  ;;  %v3512_v50 = vld [vmem:[#allocation5 + $0x6b8] sm:$0xf0]  ;;  %v3387_v53 = vor.u32 %v4081_v46, %v3384_v47 }
  0xca   :  { %1781 = vmatpush.bf16.msrb.mxu1 %v2747_v58  ;;  %1794 = vmatpush.bf16.msrb.mxu2 %v2875_v59  ;;  %v2664_v58 = vld [vmem:[#allocation5 + $0x18] sm:$0xf0]  ;;  %v3933_v59 = vld [vmem:[#allocation5 + $0x10c] sm:$0xf] }
  0xcb   :  { %1807 = vmatpush.bf16.msrb.mxu3 %v3003_v63  ;;  %v2920_v63 = vld [vmem:[#allocation5 + $0x218] sm:$0xf0]  ;;  %v2667_v11 = vor.u32 %v3901_v57, %v2664_v58  ;;  %v2795_v12 = vor.u32 %v3933_v59, %v2792_v61  ;;  %v3515_v57 = vor.u32 %v4113_v48, %v3512_v50  ;;  %v4077_v59 = vld [vmem:[#allocation5 + $0x58c] sm:$0xf] }
  0xcc   :  { %1769 = vmatpush.bf16.msrb.mxu0 %v3495_v7  ;;  %v4524_v44 = vpop.f32.mrf.mxu2  ;;  %v4526_v49 = vpop.f32.mrf.mxu3  ;;  %v3288_v7 = vld [vmem:[#allocation5 + $0x4f8] sm:$0xf0]  ;;  %v2923_v16 = vor.u32 %v3965_v62, %v2920_v63  ;;  %v4105_v10 = vld [vmem:[#allocation5 + $0x66c] sm:$0xf] }
  0xcd   :  { %v3240_v58 = vld [vmem:[#allocation5 + $0x498] sm:$0xf0]  ;;  %v4065_v46 = vld [vmem:[#allocation5 + $0x52c] sm:$0xf] }
  0xce   :  { %1782 = vmatpush.bf16.msrb.mxu1 %v2731_v8  ;;  %1795 = vmatpush.bf16.msrb.mxu2 %v2859_v9  ;;  %v4089_v8 = vld [vmem:[#allocation5 + $0x5ec] sm:$0xf]  ;;  %v3416_v9 = vld [vmem:[#allocation5 + $0x5f8] sm:$0xf0] }
  0xcf   :  { %1808 = vmatpush.bf16.msrb.mxu3 %v2987_v13  ;;  %v4121_v13 = vld [vmem:[#allocation5 + $0x6ec] sm:$0xf]  ;;  %v3496_v61 = vld [vmem:[#allocation5 + $0x698] sm:$0xf0] }
  0xd0   :  { %1770 = vmatpush.bf16.msrb.mxu0 %v3479_v19  ;;  %v3291_v19 = vor.u32 %v4057_v2, %v3288_v7  ;;  %v3547_v26 = vor.u32 %v4121_v13, %v3544_v14  ;;  %v3096_v2 = vld [vmem:[#allocation5 + $0x378] sm:$0xf0]  ;;  %v4097_v48 = vld [vmem:[#allocation5 + $0x62c] sm:$0xf] }
  0xd1   :  { %v3224_v7 = vld [vmem:[#allocation5 + $0x478] sm:$0xf0]  ;;  %v3099_v13 = vor.u32 %v4009_v1, %v3096_v2 }
  0xd2   :  { %1783 = vmatpush.bf16.msrb.mxu1 %v2715_v22  ;;  %1796 = vmatpush.bf16.msrb.mxu2 %v2843_v23  ;;  %v3419_v22 = vor.u32 %v4089_v8, %v3416_v9  ;;  %v4021_v23 = vld [vmem:[#allocation5 + $0x3cc] sm:$0xf]  ;;  %v3352_v9 = vld [vmem:[#allocation5 + $0x578] sm:$0xf0]  ;;  %v3227_v14 = vor.u32 %v4041_v3, %v3224_v7 }
  0xd3   :  { %1809 = vmatpush.bf16.msrb.mxu3 %v2971_v27  ;;  %v3272_v27 = vld [vmem:[#allocation5 + $0x4d8] sm:$0xf0]  ;;  %v3147_v32 = vor.u32 %v4021_v23, %v3144_v24  ;;  %v4073_v8 = vld [vmem:[#allocation5 + $0x56c] sm:$0xf] }
  0xd4   :  { %1771 = vmatpush.bf16.msrb.mxu0 %v3463_v34  ;;  %v1543_v15 = vpop.f32.mrf.mxu2  ;;  %v1556_v18 = vpop.f32.mrf.mxu3  ;;  %v3275_v34 = vor.u32 %v4053_v25, %v3272_v27  ;;  %v3208_v23 = vld [vmem:[#allocation5 + $0x458] sm:$0xf0]  ;;  %v4069_v24 = vld [vmem:[#allocation5 + $0x54c] sm:$0xf] }
  0xd5   :  { %v3355_v15 = vor.u32 %v4073_v8, %v3352_v9  ;;  %v4037_v18 = vld [vmem:[#allocation5 + $0x44c] sm:$0xf]  ;;  %v3336_v25 = vld [vmem:[#allocation5 + $0x558] sm:$0xf0] }
  0xd6   :  { %1784 = vmatpush.bf16.msrb.mxu1 %v2699_v36  ;;  %1797 = vmatpush.bf16.msrb.mxu2 %v2827_v38  ;;  %v3403_v36 = vor.u32 %v4085_v28, %v3400_v29  ;;  %v4017_v38 = vld [vmem:[#allocation5 + $0x3ac] sm:$0xf]  ;;  %v3464_v27 = vld [vmem:[#allocation5 + $0x658] sm:$0xf0] }
  0xd7   :  { %1810 = vmatpush.bf16.msrb.mxu3 %v2955_v45  ;;  %v3256_v45 = vld [vmem:[#allocation5 + $0x4b8] sm:$0xf0]  ;;  %v3131_v51 = vor.u32 %v4017_v38, %v3128_v39  ;;  %v4001_v38 = vld [vmem:[#allocation5 + $0x32c] sm:$0xf] }
  0xd8   :  { %1772 = vmatpush.bf16.msrb.mxu0 %v3447_v52  ;;  %v3259_v52 = vor.u32 %v4049_v42, %v3256_v45  ;;  %v3064_v39 = vld [vmem:[#allocation5 + $0x338] sm:$0xf0]  ;;  %v4033_v42 = vld [vmem:[#allocation5 + $0x42c] sm:$0xf] }
  0xd9   :  { %v3192_v45 = vld [vmem:[#allocation5 + $0x438] sm:$0xf0] }
  0xda   :  { %1785 = vmatpush.bf16.msrb.mxu1 %v2683_v55  ;;  %1798 = vmatpush.bf16.msrb.mxu2 %v2811_v56  ;;  %v3112_v55 = vld [vmem:[#allocation5 + $0x398] sm:$0xf0]  ;;  %v4045_v56 = vld [vmem:[#allocation5 + $0x48c] sm:$0xf] }
  0xdb   :  { %1811 = vmatpush.bf16.msrb.mxu3 %v2939_v60  ;;  %v4109_v60 = vld [vmem:[#allocation5 + $0x68c] sm:$0xf]  ;;  %v3320_v47 = vld [vmem:[#allocation5 + $0x538] sm:$0xf0] }
  0xdc   :  { %1773 = vmatpush.bf16.msrb.mxu0 %v3431_v5  ;;  %v4532_v62 = vpop.f32.mrf.mxu0  ;;  %v3499_v5 = vor.u32 %v4109_v60, %v3496_v61  ;;  %v3448_v50 = vld [vmem:[#allocation5 + $0x638] sm:$0xf0]  ;;  %v4061_v60 = vld [vmem:[#allocation5 + $0x50c] sm:$0xf] }
  0xdd   :  { %v3304_v61 = vld [vmem:[#allocation5 + $0x518] sm:$0xf0] }
  0xde   :  { %1786 = vmatpush.bf16.msrb.mxu1 %v2667_v11  ;;  %1799 = vmatpush.bf16.msrb.mxu2 %v2795_v12  ;;  %v4534_v63 = vpop.f32.mrf.mxu1  ;;  %v3480_v11 = vld [vmem:[#allocation5 + $0x678] sm:$0xf0]  ;;  %v4536_v12 = vld [vmem:[#allocation7] sm:$0xf]  ;;  %v3307_v9 = vor.u32 %v4061_v60, %v3304_v61 }
  0xdf   :  { %1812 = vmatpush.bf16.msrb.mxu3 %v2923_v16  ;;  %1774 = vmatmul.bf16.vlgmr.msrb.gmra.mxu0 %v4498_v37  ;;  %v4005_v16 = vld [vmem:[#allocation5 + $0x34c] sm:$0xf]  ;;  %v353_v29 = vperm.slane %v4536_v12, 0  ;;  %v4139_v1 = vld [vmem:[#allocation8 + $0x74] sm:$0xf0] }
  0xe0   :  { %1818 = vmatpush.bf16.msra.mxu0 %v3163_v17  ;;  %v3080_v17 = vld [vmem:[#allocation5 + $0x358] sm:$0xf0] }
  0xe1   :  { %1800 = vmatmul.bf16.vlgmr.msrb.gmra.mxu2 %v4493_v21  ;;  %1787 = vmatmul.bf16.vlgmr.msrb.gmra.mxu1 %v4491_v20  ;;  %v3368_v21 = vld [vmem:[#allocation5 + $0x598] sm:$0xf0]  ;;  %v3243_v20 = vor.u32 %v4045_v56, %v3240_v58  ;;  %v3083_v30 = vor.u32 %v4005_v16, %v3080_v17  ;;  %v4029_v56 = vld [vmem:[#allocation5 + $0x40c] sm:$0xf]  ;;  %v3662_v16 = vld [vmem:[#allocation8 + $0xe0] sm:$0xf] }
  0xe2   :  { %1831 = vmatpush.bf16.msra.mxu1 %v3291_v19  ;;  %1844 = vmatpush.bf16.msra.mxu2 %v3419_v22  ;;  %v3371_v0 = vor.u32 %v4077_v59, %v3368_v21  ;;  %v3483_v22 = vor.u32 %v4105_v10, %v3480_v11  ;;  %v1516_v59 = vadd.f32 %v4520_v33, %v353_v29  ;;  %v4155_v7 = vld [vmem:[#allocation8 + $0xf4] sm:$0xf0]  ;;  %v4153_v17 = vld [vmem:[#allocation8 + $0xe4] sm:$0xf0]  ;;  %v3582_v29 = vld [vmem:[#allocation8 + $0x40] sm:$0xf] }
  0xe3   :  { %1857 = vmatpush.bf16.msra.mxu3 %v3547_v26  ;;  %v4101_v26 = vld [vmem:[#allocation5 + $0x64c] sm:$0xf]  ;;  %v3451_v21 = vor.u32 %v4097_v48, %v3448_v50  ;;  %v4143_v60 = vld [vmem:[#allocation8 + $0x94] sm:$0xf0] }
  0xe4   :  { %1813 = vmatmul.bf16.vlgmr.msrb.gmra.mxu3 %v4486_v4  ;;  %1819 = vmatpush.bf16.msra.mxu0 %v3147_v32  ;;  %v3115_v4 = vor.u32 %v4013_v54, %v3112_v55  ;;  %v4538_v19 = vpop.f32.mrf.mxu2  ;;  %v1569_v31 = vpop.f32.mrf.mxu0  ;;  %v3323_v54 = vor.u32 %v4065_v46, %v3320_v47  ;;  %v3048_v55 = vld [vmem:[#allocation5 + $0x318] sm:$0xf0]  ;;  %v1529_v10 = vadd.f32 %v4522_v35, %v1516_v59  ;;  %v3590_v35 = vld [vmem:[#allocation8 + $0x50] sm:$0xf]  ;;  %v3566_v46 = vld [vmem:[#allocation8 + $0x20] sm:$0xf] }
  0xe5   :  { %v3646_v31 = vld [vmem:[#allocation8 + $0xc0] sm:$0xf]  ;;  %v4129_v47 = vld [vmem:[#allocation8 + $0x24] sm:$0xf0] }
  0xe6   :  { %1832 = vmatpush.bf16.msra.mxu1 %v3275_v34  ;;  %1845 = vmatpush.bf16.msra.mxu2 %v3403_v36  ;;  %v1582_v32 = vpop.f32.mrf.mxu1  ;;  %v3211_v34 = vor.u32 %v4037_v18, %v3208_v23  ;;  %v3339_v36 = vor.u32 %v4069_v24, %v3336_v25  ;;  %v1542_v18 = vadd.f32 %v4524_v44, %v1529_v10  ;;  %v4135_v23 = vld [vmem:[#allocation8 + $0x54] sm:$0xf0]  ;;  %v3654_v25 = vld [vmem:[#allocation8 + $0xd0] sm:$0xf]  ;;  %v4154_v10 = vld [vmem:[#allocation8 + $0xf4] sm:$0xf] }
  0xe7   :  { %1858 = vmatpush.bf16.msra.mxu3 %v3531_v43  ;;  %v4540_v28 = vpop.f32.mrf.mxu3  ;;  %v3467_v43 = vor.u32 %v4101_v26, %v3464_v27  ;;  %v3663_v24 = vor.u32 %v4153_v17, %v3662_v16  ;;  %v4151_v26 = vld [vmem:[#allocation8 + $0xd4] sm:$0xf0]  ;;  %v3591_v44 = vor.u32 %v4135_v23, %v3590_v35  ;;  %v4149_v32 = vld [vmem:[#allocation8 + $0xc4] sm:$0xf0]  ;;  %v4136_v16 = vld [vmem:[#allocation8 + $0x64] sm:$0xf] }
  0xe8   :  { %1820 = vmatpush.bf16.msra.mxu0 %v3131_v51  ;;  %v3067_v51 = vor.u32 %v4001_v38, %v3064_v39  ;;  %v1555_v27 = vadd.f32 %v4526_v49, %v1542_v18  ;;  %v4131_v38 = vld [vmem:[#allocation8 + $0x34] sm:$0xf0]  ;;  %v3647_v39 = vor.u32 %v4149_v32, %v3646_v31  ;;  %v3600_v17 = vld [vmem:[#allocation8 + $0x68] sm:$0xf0]  ;;  %v4169_v32 = vld [vmem:[#allocation8 + $0x164] sm:$0xf0] }
  0xe9   :  { %v4147_v49 = vld [vmem:[#allocation8 + $0xb4] sm:$0xf0]  ;;  %v3664_v35 = vld [vmem:[#allocation8 + $0xe8] sm:$0xf0] }
  0xea   :  { %1833 = vmatpush.bf16.msra.mxu1 %v3259_v52  ;;  %1846 = vmatpush.bf16.msra.mxu2 %v3387_v53  ;;  %v3997_v52 = vld [vmem:[#allocation5 + $0x30c] sm:$0xf]  ;;  %v3195_v53 = vor.u32 %v4033_v42, %v3192_v45  ;;  %v3638_v42 = vld [vmem:[#allocation8 + $0xb0] sm:$0xf] }
  0xeb   :  { %1859 = vmatpush.bf16.msra.mxu3 %v3515_v57  ;;  %v3176_v57 = vld [vmem:[#allocation5 + $0x418] sm:$0xf0]  ;;  %v3051_v3 = vor.u32 %v3997_v52, %v3048_v55  ;;  %v3639_v48 = vor.u32 %v4147_v49, %v3638_v42  ;;  %v4145_v52 = vld [vmem:[#allocation8 + $0xa4] sm:$0xf0]  ;;  %v3567_v55 = vor.u32 %v4129_v47, %v3566_v46  ;;  %v4132_v42 = vld [vmem:[#allocation8 + $0x44] sm:$0xf] }
  0xec   :  { %1821 = vmatpush.bf16.msra.mxu0 %v3115_v4  ;;  %v1595_v58 = vpop.f32.mrf.mxu2  ;;  %v4093_v4 = vld [vmem:[#allocation5 + $0x60c] sm:$0xf]  ;;  %v3179_v8 = vor.u32 %v4029_v56, %v3176_v57  ;;  %v4127_v57 = vld [vmem:[#allocation8 + $0x14] sm:$0xf0]  ;;  %v3584_v49 = vld [vmem:[#allocation8 + $0x48] sm:$0xf0] }
  0xed   :  { %v3648_v46 = vld [vmem:[#allocation8 + $0xc8] sm:$0xf0] }
  0xee   :  { %1834 = vmatpush.bf16.msra.mxu1 %v3243_v20  ;;  %1847 = vmatpush.bf16.msra.mxu2 %v3371_v0  ;;  %v3432_v20 = vld [vmem:[#allocation5 + $0x618] sm:$0xf0]  ;;  %v3606_v0 = vld [vmem:[#allocation8 + $0x70] sm:$0xf] }
  0xef   :  { %1860 = vmatpush.bf16.msra.mxu3 %v3499_v5  ;;  %v1608_v2 = vpop.f32.mrf.mxu3  ;;  %v3670_v5 = vld [vmem:[#allocation8 + $0xf0] sm:$0xf]  ;;  %v3435_v33 = vor.u32 %v4093_v4, %v3432_v20  ;;  %v3607_v11 = vor.u32 %v4139_v1, %v3606_v0  ;;  %v3550_v0 = vld [vmem:[#allocation8] sm:$0xf]  ;;  %v4138_v1 = vld [vmem:[#allocation8 + $0x74] sm:$0xf] }
  0xf0   :  { %1822 = vmatpush.bf16.msra.mxu0 %v3099_v13  ;;  %v3598_v13 = vld [vmem:[#allocation8 + $0x60] sm:$0xf] }
  0xf2   :  { %1835 = vmatpush.bf16.msra.mxu1 %v3227_v14  ;;  %1848 = vmatpush.bf16.msra.mxu2 %v3355_v15  ;;  %v4137_v14 = vld [vmem:[#allocation8 + $0x64] sm:$0xf0]  ;;  %v3671_v15 = vor.u32 %v4155_v7, %v3670_v5  ;;  %v3608_v5 = vld [vmem:[#allocation8 + $0x78] sm:$0xf0]  ;;  %v3614_v7 = vld [vmem:[#allocation8 + $0x80] sm:$0xf] }
  0xf3   :  { %1861 = vmatpush.bf16.msra.mxu3 %v3483_v22  ;;  %v3599_v22 = vor.u32 %v4137_v14, %v3598_v13  ;;  %v3611_v14 = vor.u32 %v4138_v1, %v3608_v5 }
  0xf4   :  { %1823 = vmatpush.bf16.msra.mxu0 %v3083_v30  ;;  %v4133_v30 = vld [vmem:[#allocation8 + $0x44] sm:$0xf0] }
  0xf6   :  { %1836 = vmatpush.bf16.msra.mxu1 %v3211_v34  ;;  %1849 = vmatpush.bf16.msra.mxu2 %v3339_v36  ;;  %v1568_v34 = vadd.f32 %v4532_v62, %v1555_v27  ;;  %v3603_v27 = vor.u32 %v4136_v16, %v3600_v17 }
  0xf7   :  { %1862 = vmatpush.bf16.msra.mxu3 %v3467_v43 }
  0xf8   :  { %1824 = vmatpush.bf16.msra.mxu0 %v3067_v51  ;;  %v1581_v43 = vadd.f32 %v4534_v63, %v1568_v34  ;;  %v3630_v51 = vld [vmem:[#allocation8 + $0xa0] sm:$0xf]  ;;  %v3558_v63 = vld [vmem:[#allocation8 + $0x10] sm:$0xf]  ;;  %v4150_v34 = vld [vmem:[#allocation8 + $0xd4] sm:$0xf] }
  0xf9   :  { %v3631_v58 = vor.u32 %v4145_v52, %v3630_v51  ;;  %v3559_v20 = vor.u32 %v4127_v57, %v3558_v63  ;;  %v3710_v51 = vld [vmem:[#allocation8 + $0x140] sm:$0xf]  ;;  %v4165_v52 = vld [vmem:[#allocation8 + $0x144] sm:$0xf0]  ;;  %v3576_v63 = vld [vmem:[#allocation8 + $0x38] sm:$0xf0] }
  0xfa   :  { %1837 = vmatpush.bf16.msra.mxu1 %v3195_v53  ;;  %1850 = vmatpush.bf16.msra.mxu2 %v3323_v54  ;;  %v1594_v53 = vadd.f32 %v4538_v19, %v1581_v43  ;;  %v354_v54 = vperm.slane %v4536_v12, 1  ;;  %v4125_v19 = vld [vmem:[#allocation8 + $0x4] sm:$0xf0] }
  0xfb   :  { %1863 = vmatpush.bf16.msra.mxu3 %v3451_v21  ;;  %v3622_v21 = vld [vmem:[#allocation8 + $0x90] sm:$0xf]  ;;  %v3551_v13 = vor.u32 %v4125_v19, %v3550_v0  ;;  %v3568_v19 = vld [vmem:[#allocation8 + $0x28] sm:$0xf0] }
  0xfc   :  { %1825 = vmatpush.bf16.msra.mxu0 %v3051_v3  ;;  %v1619_v36 = vpop.f32.mrf.mxu0  ;;  %v1874_v61 = vmul.f32 0.2, %v1594_v53  ;;  %v1607_v4 = vadd.f32 %v4540_v28, %v354_v54  ;;  %v3623_v2 = vor.u32 %v4143_v60, %v3622_v21  ;;  %vm1870_vm0 = vcmp.gt.f32.partialorder %v1594_v53, 0.0 }
  0xfd   :  { %v3587_v54 = vor.u32 %v4132_v42, %v3584_v49  ;;  %v3711_v21 = vor.u32 %v4165_v52, %v3710_v51  ;;  %v4166_v51 = vld [vmem:[#allocation8 + $0x154] sm:$0xf] }
  0xfe   :  { %1838 = vmatpush.bf16.msra.mxu1 %v3179_v8  ;;  %1851 = vmatpush.bf16.msra.mxu2 %v3307_v9  ;;  %v4141_v8 = vld [vmem:[#allocation8 + $0x84] sm:$0xf0] }
  0xff   :  { %1864 = vmatpush.bf16.msra.mxu3 %v3435_v33  ;;  %1826 = vmatmul.bf16.vlgmr.msra.gmra.mxu0 %v4488_v6  ;;  %v3655_v6 = vor.u32 %v4151_v26, %v3654_v25  ;;  %v3672_v33 = vld [vmem:[#allocation8 + $0xf8] sm:$0xf0]  ;;  %v3615_v28 = vor.u32 %v4141_v8, %v3614_v7  ;;  %v4171_v25 = vld [vmem:[#allocation8 + $0x174] sm:$0xf0] }
 0x100   :  { %2276 = vmatpush.bf16.msrb.mxu0 %v3607_v11  ;;  %v1620_v11 = vadd.f32 %v1619_v36, %v1607_v4  ;;  %v3675_v18 = vor.u32 %v4154_v10, %v3672_v33  ;;  %v4163_v4 = vld [vmem:[#allocation8 + $0x134] sm:$0xf0]  ;;  %v4161_v10 = vld [vmem:[#allocation8 + $0x124] sm:$0xf0] }
 0x101   :  { %1839 = vmatmul.bf16.vlgmr.msra.gmra.mxu1 %v4500_v40  ;;  %1852 = vmatmul.bf16.vlgmr.msra.gmra.mxu2 %v4502_v41  ;;  %v3583_v40 = vor.u32 %v4133_v30, %v3582_v29  ;;  %v3574_v41 = vld [vmem:[#allocation8 + $0x30] sm:$0xf]  ;;  %v3726_v29 = vld [vmem:[#allocation8 + $0x160] sm:$0xf]  ;;  %v4134_v30 = vld [vmem:[#allocation8 + $0x54] sm:$0xf] }
 0x102   :  { %2289 = vmatpush.bf16.msrb.mxu1 %v3671_v15  ;;  %1865 = vmatmul.bf16.vlgmr.msra.gmra.mxu3 %v4498_v37  ;;  %v1632_v37 = vpop.f32.mrf.mxu1  ;;  %v3575_v45 = vor.u32 %v4131_v38, %v3574_v41  ;;  %v1878_v15 = vsel %vm1870_vm0, %v1594_v53, %v1874_v61  ;;  %v3727_v36 = vor.u32 %v4169_v32, %v3726_v29  ;;  %v3718_v38 = vld [vmem:[#allocation8 + $0x150] sm:$0xf] }
 0x103   :  { %v1633_v23 = vadd.f32 %v1632_v37, %v1620_v11  ;;  %v4560_v26 = vpack.c.bf16 %v1878_v15, %v1878_v15  ;;  %v3702_v61 = vld [vmem:[#allocation8 + $0x130] sm:$0xf]  ;;  %v3560_v15 = vld [vmem:[#allocation8 + $0x18] sm:$0xf0] }
 0x104   :  { %2277 = vmatpush.bf16.msrb.mxu0 %v3599_v22  ;;  %v4553_v50 = vpop.f32.mrf.mxu2  ;;  %v1621_v56 = vpop.f32.mrf.mxu0  ;;  %v4152_v22 = vld [vmem:[#allocation8 + $0xe4] sm:$0xf]  ;;  %v3703_v5 = vor.u32 %v4163_v4, %v3702_v61  ;;  %v3782_v61 = vld [vmem:[#allocation8 + $0x1d0] sm:$0xf]  ;;  %v4183_v4 = vld [vmem:[#allocation8 + $0x1d4] sm:$0xf0] }
 0x105   :  { %v3667_v31 = vor.u32 %v4152_v22, %v3664_v35  ;;  %v1646_v41 = vadd.f32 %v4553_v50, %v1633_v23  ;;  %v4130_v56 = vld [vmem:[#allocation8 + $0x34] sm:$0xf]  ;;  %v3624_v22 = vld [vmem:[#allocation8 + $0x98] sm:$0xf0]  ;;  %v3686_v23 = vld [vmem:[#allocation8 + $0x110] sm:$0xf] }
 0x106   :  { %2290 = vmatpush.bf16.msrb.mxu1 %v3663_v24  ;;  %v3734_v24 = vld [vmem:[#allocation8 + $0x170] sm:$0xf] }
 0x107   :  { %v4555_v62 = vpop.f32.mrf.mxu3 }
 0x108   :  { %2278 = vmatpush.bf16.msrb.mxu0 %v3591_v44  ;;  %v3735_v44 = vor.u32 %v4171_v25, %v3734_v24  ;;  %v4159_v24 = vld [vmem:[#allocation8 + $0x114] sm:$0xf0] }
 0x10a   :  { %2291 = vmatpush.bf16.msrb.mxu1 %v3655_v6  ;;  %v1634_v59 = vpop.f32.mrf.mxu1  ;;  %v3592_v6 = vld [vmem:[#allocation8 + $0x58] sm:$0xf0]  ;;  %2302 = vmatpush.bf16.msrb.mxu2 %v3735_v44  ;;  %v3552_v44 = vld [vmem:[#allocation8 + $0x8] sm:$0xf0] }
 0x10b   :  { %v3595_v37 = vor.u32 %v4134_v30, %v3592_v6  ;;  %v3640_v59 = vld [vmem:[#allocation8 + $0xb8] sm:$0xf0]  ;;  %v4140_v30 = vld [vmem:[#allocation8 + $0x84] sm:$0xf]  ;;  %v3616_v6 = vld [vmem:[#allocation8 + $0x88] sm:$0xf0] }
 0x10c   :  { %2279 = vmatpush.bf16.msrb.mxu0 %v3583_v40  ;;  %v1647_v3 = vpop.f32.mrf.mxu2  ;;  %v3656_v40 = vld [vmem:[#allocation8 + $0xd8] sm:$0xf0] }
 0x10d   :  { %v3659_v43 = vor.u32 %v4150_v34, %v3656_v40  ;;  %v3632_v3 = vld [vmem:[#allocation8 + $0xa8] sm:$0xf0]  ;;  %v3678_v34 = vld [vmem:[#allocation8 + $0x100] sm:$0xf]  ;;  %v4157_v40 = vld [vmem:[#allocation8 + $0x104] sm:$0xf0] }
 0x10e   :  { %2292 = vmatpush.bf16.msrb.mxu1 %v3647_v39  ;;  %v4167_v39 = vld [vmem:[#allocation8 + $0x154] sm:$0xf0]  ;;  %2303 = vmatpush.bf16.msrb.mxu2 %v3727_v36  ;;  %v3679_v42 = vor.u32 %v4157_v40, %v3678_v34 }
 0x10f   :  { %v1660_v9 = vpop.f32.mrf.mxu3  ;;  %v3719_v47 = vor.u32 %v4167_v39, %v3718_v38  ;;  %v4170_v38 = vld [vmem:[#allocation8 + $0x174] sm:$0xf]  ;;  %v3736_v39 = vld [vmem:[#allocation8 + $0x178] sm:$0xf0] }
 0x110   :  { %2280 = vmatpush.bf16.msrb.mxu0 %v3575_v45  ;;  %v4148_v45 = vld [vmem:[#allocation8 + $0xc4] sm:$0xf]  ;;  %v3694_v9 = vld [vmem:[#allocation8 + $0x120] sm:$0xf]  ;;  %v3739_v49 = vor.u32 %v4170_v38, %v3736_v39  ;;  %v4186_v39 = vld [vmem:[#allocation8 + $0x1f4] sm:$0xf] }
 0x111   :  { %v3651_v57 = vor.u32 %v4148_v45, %v3648_v46  ;;  %v3695_v35 = vor.u32 %v4161_v10, %v3694_v9  ;;  %v3728_v45 = vld [vmem:[#allocation8 + $0x168] sm:$0xf0] }
 0x112   :  { %2293 = vmatpush.bf16.msrb.mxu1 %v3639_v48  ;;  %v1659_v48 = vadd.f32 %v4555_v62, %v1646_v41  ;;  %2304 = vmatpush.bf16.msrb.mxu2 %v3719_v47  ;;  %v3579_v62 = vor.u32 %v4130_v56, %v3576_v63  ;;  %v3798_v47 = vld [vmem:[#allocation8 + $0x1f0] sm:$0xf]  ;;  %v3790_v56 = vld [vmem:[#allocation8 + $0x1e0] sm:$0xf]  ;;  %v4185_v63 = vld [vmem:[#allocation8 + $0x1e4] sm:$0xf0] }
 0x114   :  { %2281 = vmatpush.bf16.msrb.mxu0 %v3567_v55 }
 0x116   :  { %2294 = vmatpush.bf16.msrb.mxu1 %v3631_v58  ;;  %v4146_v58 = vld [vmem:[#allocation8 + $0xb4] sm:$0xf]  ;;  %2305 = vmatpush.bf16.msrb.mxu2 %v3711_v21  ;;  %v355_v21 = vperm.slane %v4536_v12, 2 }
 0x117   :  { %v3643_v1 = vor.u32 %v4146_v58, %v3640_v59  ;;  %v3791_v58 = vor.u32 %v4185_v63, %v3790_v56  ;;  %v3712_v59 = vld [vmem:[#allocation8 + $0x148] sm:$0xf0] }
 0x118   :  { %2282 = vmatpush.bf16.msrb.mxu0 %v3559_v20  ;;  %v4128_v20 = vld [vmem:[#allocation8 + $0x24] sm:$0xf] }
 0x119   :  { %v3571_v11 = vor.u32 %v4128_v20, %v3568_v19  ;;  %v3783_v20 = vor.u32 %v4183_v4, %v3782_v61  ;;  %v3704_v19 = vld [vmem:[#allocation8 + $0x138] sm:$0xf0]  ;;  %v4178_v61 = vld [vmem:[#allocation8 + $0x1b4] sm:$0xf] }
 0x11a   :  { %2295 = vmatpush.bf16.msrb.mxu1 %v3623_v2  ;;  %v4144_v2 = vld [vmem:[#allocation8 + $0xa4] sm:$0xf]  ;;  %2306 = vmatpush.bf16.msrb.mxu2 %v3703_v5  ;;  %v3768_v4 = vld [vmem:[#allocation8 + $0x1b8] sm:$0xf0] }
 0x11b   :  { %v3635_v16 = vor.u32 %v4144_v2, %v3632_v3  ;;  %v3774_v2 = vld [vmem:[#allocation8 + $0x1c0] sm:$0xf]  ;;  %v4181_v3 = vld [vmem:[#allocation8 + $0x1c4] sm:$0xf0]  ;;  %v4160_v5 = vld [vmem:[#allocation8 + $0x124] sm:$0xf] }
 0x11c   :  { %2283 = vmatpush.bf16.msrb.mxu0 %v3551_v13  ;;  %v1671_v53 = vpop.f32.mrf.mxu0  ;;  %v3775_v10 = vor.u32 %v4181_v3, %v3774_v2  ;;  %v356_v3 = vperm.slane %v4536_v12, 3 }
 0x11d   :  { %v1672_v50 = vadd.f32 %v1671_v53, %v1659_v48  ;;  %v4187_v48 = vld [vmem:[#allocation8 + $0x1f4] sm:$0xf0]  ;;  %v3720_v53 = vld [vmem:[#allocation8 + $0x158] sm:$0xf0] }
 0x11e   :  { %2296 = vmatpush.bf16.msrb.mxu1 %v3615_v28  ;;  %v1684_v55 = vpop.f32.mrf.mxu1  ;;  %v4126_v28 = vld [vmem:[#allocation8 + $0x14] sm:$0xf]  ;;  %2307 = vmatpush.bf16.msrb.mxu2 %v3695_v35  ;;  %v3799_v52 = vor.u32 %v4187_v48, %v3798_v47 }
 0x11f   :  { %2284 = vmatmul.bf16.vlgmr.msrb.gmra.mxu0 %v4560_v26  ;;  %v1685_v60 = vadd.f32 %v1684_v55, %v1672_v50  ;;  %v3563_v25 = vor.u32 %v4126_v28, %v3560_v15  ;;  %v3766_v28 = vld [vmem:[#allocation8 + $0x1b0] sm:$0xf]  ;;  %v4179_v15 = vld [vmem:[#allocation8 + $0x1b4] sm:$0xf0] }
 0x120   :  { %2328 = vmatpush.bf16.msra.mxu0 %v3611_v14  ;;  %2315 = vmatpush.bf16.msrb.mxu3 %v3799_v52 }
 0x121   :  { %vm1871_vm1 = vcmp.gt.f32.partialorder %v1685_v60, 0.0  ;;  %v1875_v0 = vmul.f32 0.2, %v1685_v60 }
 0x122   :  { %2341 = vmatpush.bf16.msra.mxu1 %v3675_v18  ;;  %v4142_v18 = vld [vmem:[#allocation8 + $0x94] sm:$0xf] }
 0x123   :  { %v1879_v7 = vsel %vm1871_vm1, %v1685_v60, %v1875_v0  ;;  %v3627_v29 = vor.u32 %v4142_v18, %v3624_v22  ;;  %v4162_v0 = vld [vmem:[#allocation8 + $0x134] sm:$0xf]  ;;  %v3767_v22 = vor.u32 %v4179_v15, %v3766_v28 }
 0x124   :  { %2329 = vmatpush.bf16.msra.mxu0 %v3603_v27  ;;  %v4565_v8 = vpop.f32.mrf.mxu2  ;;  %v1883_v33 = vpack.c.bf16 %v1879_v7, %v1879_v7  ;;  %v1673_v14 = vpop.f32.mrf.mxu0  ;;  %v4124_v27 = vld [vmem:[#allocation8 + $0x4] sm:$0xf]  ;;  %2316 = vmatpush.bf16.msrb.mxu3 %v3791_v58 }
 0x125   :  { %v3555_v36 = vor.u32 %v4124_v27, %v3552_v44  ;;  %v1698_v7 = vadd.f32 %v4565_v8, %v355_v21  ;;  %v4177_v8 = vld [vmem:[#allocation8 + $0x1a4] sm:$0xf0]  ;;  %v4156_v27 = vld [vmem:[#allocation8 + $0x104] sm:$0xf]  ;;  %v3680_v44 = vld [vmem:[#allocation8 + $0x108] sm:$0xf0] }
 0x126   :  { %2342 = vmatpush.bf16.msra.mxu1 %v3667_v31  ;;  %v1686_v17 = vpop.f32.mrf.mxu1  ;;  %v3687_v31 = vor.u32 %v4159_v24, %v3686_v23  ;;  %v3758_v24 = vld [vmem:[#allocation8 + $0x1a0] sm:$0xf] }
 0x127   :  { %v4567_v13 = vpop.f32.mrf.mxu3  ;;  %2297 = vmatmul.bf16.vlgmr.msrb.gmra.mxu1 %v1883_v33  ;;  %v3688_v17 = vld [vmem:[#allocation8 + $0x118] sm:$0xf0] }
 0x128   :  { %2330 = vmatpush.bf16.msra.mxu0 %v3595_v37  ;;  %v3619_v37 = vor.u32 %v4140_v30, %v3616_v6  ;;  %2308 = vmatpush.bf16.msrb.mxu2 %v3687_v31  ;;  %v1711_v18 = vadd.f32 %v4567_v13, %v1698_v7  ;;  %v3759_v30 = vor.u32 %v4177_v8, %v3758_v24  ;;  %v4175_v13 = vld [vmem:[#allocation8 + $0x194] sm:$0xf0]  ;;  %v3752_v7 = vld [vmem:[#allocation8 + $0x198] sm:$0xf0] }
 0x129   :  { %2317 = vmatpush.bf16.msrb.mxu3 %v3783_v20  ;;  %v3683_v6 = vor.u32 %v4156_v27, %v3680_v44  ;;  %v4176_v20 = vld [vmem:[#allocation8 + $0x1a4] sm:$0xf] }
 0x12a   :  { %2343 = vmatpush.bf16.msra.mxu1 %v3659_v43  ;;  %v4168_v43 = vld [vmem:[#allocation8 + $0x164] sm:$0xf] }
 0x12b   :  { %v3731_v46 = vor.u32 %v4168_v43, %v3728_v45  ;;  %v4184_v45 = vld [vmem:[#allocation8 + $0x1e4] sm:$0xf] }
 0x12c   :  { %2331 = vmatpush.bf16.msra.mxu0 %v3587_v54  ;;  %v1699_v32 = vpop.f32.mrf.mxu2  ;;  %2309 = vmatpush.bf16.msrb.mxu2 %v3679_v42  ;;  %v3723_v54 = vor.u32 %v4166_v51, %v3720_v53 }
 0x12d   :  { %2318 = vmatpush.bf16.msrb.mxu3 %v3775_v10  ;;  %v3750_v32 = vld [vmem:[#allocation8 + $0x190] sm:$0xf] }
 0x12e   :  { %2344 = vmatpush.bf16.msra.mxu1 %v3651_v57  ;;  %v4164_v57 = vld [vmem:[#allocation8 + $0x144] sm:$0xf]  ;;  %v3751_v34 = vor.u32 %v4175_v13, %v3750_v32  ;;  %v1950_v32 = vld [vmem:[%s4590_s4] sm:$0x3] }
 0x12f   :  { %v1712_v41 = vpop.f32.mrf.mxu3 }
 0x130   :  { %2332 = vmatpush.bf16.msra.mxu0 %v3579_v62  ;;  %2354 = vmatpush.bf16.msra.mxu2 %v3739_v49  ;;  %v4173_v41 = vld [vmem:[#allocation8 + $0x184] sm:$0xf0] }
 0x131   :  { %2319 = vmatpush.bf16.msrb.mxu3 %v3767_v22 }
 0x132   :  { %2345 = vmatpush.bf16.msra.mxu1 %v3643_v1  ;;  %v3707_v1 = vor.u32 %v4162_v0, %v3704_v19  ;;  %v3760_v0 = vld [vmem:[#allocation8 + $0x1a8] sm:$0xf0] }
 0x133   :  { %v3763_v2 = vor.u32 %v4176_v20, %v3760_v0  ;;  %v4196_v20 = vld [vmem:[#allocation10 + $0x40] sm:$0xff]  ;;  %v4211_v0 = vld [vmem:[#allocation11 + $0x38] sm:$0xff] }
 0x134   :  { %2333 = vmatpush.bf16.msra.mxu0 %v3571_v11  ;;  %2355 = vmatpush.bf16.msra.mxu2 %v3731_v46  ;;  %v3792_v46 = vld [vmem:[#allocation8 + $0x1e8] sm:$0xf0] }
 0x135   :  { %2320 = vmatpush.bf16.msrb.mxu3 %v3759_v30  ;;  %v3795_v48 = vor.u32 %v4184_v45, %v3792_v46 }
 0x136   :  { %2346 = vmatpush.bf16.msra.mxu1 %v3635_v16  ;;  %v4158_v16 = vld [vmem:[#allocation8 + $0x114] sm:$0xf] }
 0x137   :  { %v3691_v23 = vor.u32 %v4158_v16, %v3688_v17 }
 0x138   :  { %2334 = vmatpush.bf16.msra.mxu0 %v3563_v25  ;;  %2356 = vmatpush.bf16.msra.mxu2 %v3723_v54  ;;  %v4182_v54 = vld [vmem:[#allocation8 + $0x1d4] sm:$0xf] }
 0x139   :  { %2321 = vmatpush.bf16.msrb.mxu3 %v3751_v34  ;;  %v1952_v34 = vperm.slane %v1950_v32, 0 }
 0x13a   :  { %2347 = vmatpush.bf16.msra.mxu1 %v3627_v29 }
 0x13c   :  { %2335 = vmatpush.bf16.msra.mxu0 %v3555_v36  ;;  %v1723_v50 = vpop.f32.mrf.mxu0  ;;  %v3742_v36 = vld [vmem:[#allocation8 + $0x180] sm:$0xf] }
 0x13d   :  { %v1724_v29 = vadd.f32 %v1723_v50, %v1711_v18  ;;  %v3743_v38 = vor.u32 %v4173_v41, %v3742_v36  ;;  %v3784_v50 = vld [vmem:[#allocation8 + $0x1d8] sm:$0xf0] }
 0x13e   :  { %2348 = vmatpush.bf16.msra.mxu1 %v3619_v37  ;;  %v1736_v55 = vpop.f32.mrf.mxu1  ;;  %v3800_v37 = vld [vmem:[#allocation8 + $0x1f8] sm:$0xf0]  ;;  %v3787_v56 = vor.u32 %v4182_v54, %v3784_v50  ;;  %v4202_v54 = vld [vmem:[#allocation10 + $0x70] sm:$0xff] }
 0x13f   :  { %2336 = vmatmul.bf16.vlgmr.msra.gmra.mxu0 %v4560_v26  ;;  %v3715_v26 = vor.u32 %v4164_v57, %v3712_v59  ;;  %v1737_v31 = vadd.f32 %v1736_v55, %v1724_v29  ;;  %v3803_v42 = vor.u32 %v4186_v39, %v3800_v37  ;;  %2322 = vmatpush.bf16.msrb.mxu3 %v3743_v38  ;;  %v4180_v59 = vld [vmem:[#allocation8 + $0x1c4] sm:$0xf]  ;;  %v1953_v39 = vperm.slane %v1950_v32, 1  ;;  %v4191_v50 = vld [vmem:[#allocation10 + $0x18] sm:$0xff] }
 0x141   :  { %2349 = vmatmul.bf16.vlgmr.msra.gmra.mxu1 %v1883_v33  ;;  %2357 = vmatpush.bf16.msra.mxu2 %v3715_v26  ;;  %v3696_v33 = vld [vmem:[#allocation8 + $0x128] sm:$0xf0] }
 0x142   :  { %v3699_v14 = vor.u32 %v4160_v5, %v3696_v33  ;;  %v3776_v26 = vld [vmem:[#allocation8 + $0x1c8] sm:$0xf0]  ;;  %v4174_v5 = vld [vmem:[#allocation8 + $0x194] sm:$0xf] }
 0x143   :  { %2367 = vmatpush.bf16.msra.mxu3 %v3803_v42 }
 0x144   :  { %v1749_v60 = vpop.f32.mrf.mxu2  ;;  %v1725_v9 = vpop.f32.mrf.mxu0 }
 0x145   :  { %2358 = vmatpush.bf16.msra.mxu2 %v3707_v1  ;;  %v1750_v40 = vadd.f32 %v1749_v60, %v1737_v31  ;;  %v3779_v60 = vor.u32 %v4180_v59, %v3776_v26  ;;  %v3755_v9 = vor.u32 %v4174_v5, %v3752_v7  ;;  %v4188_v59 = vld [vmem:[#allocation10] sm:$0xff] }
 0x146   :  { %v1738_v11 = vpop.f32.mrf.mxu1  ;;  %v4200_v26 = vld [vmem:[#allocation10 + $0x60] sm:$0xff] }
 0x147   :  { %v1762_v62 = vpop.f32.mrf.mxu3  ;;  %2368 = vmatpush.bf16.msra.mxu3 %v3795_v48  ;;  %v4172_v11 = vld [vmem:[#allocation8 + $0x184] sm:$0xf]  ;;  %v4194_v48 = vld [vmem:[#allocation10 + $0x30] sm:$0xff] }
 0x148   :  { %v1763_v49 = vadd.f32 %v1762_v62, %v1750_v40  ;;  %v3771_v62 = vor.u32 %v4178_v61, %v3768_v4  ;;  %v4198_v61 = vld [vmem:[#allocation10 + $0x50] sm:$0xff]  ;;  %v4197_v4 = vld [vmem:[#allocation10 + $0x48] sm:$0xff] }
 0x149   :  { %2359 = vmatpush.bf16.msra.mxu2 %v3699_v14  ;;  %v3744_v14 = vld [vmem:[#allocation8 + $0x188] sm:$0xf0] }
 0x14a   :  { %v3747_v28 = vor.u32 %v4172_v11, %v3744_v14 }
 0x14b   :  { %2369 = vmatpush.bf16.msra.mxu3 %v3787_v56 }
 0x14c   :  { %v1751_v35 = vpop.f32.mrf.mxu2 }
 0x14d   :  { %2360 = vmatpush.bf16.msra.mxu2 %v3691_v23 }
 0x14f   :  { %v1764_v25 = vpop.f32.mrf.mxu3  ;;  %2370 = vmatpush.bf16.msra.mxu3 %v3779_v60 }
 0x151   :  { %2361 = vmatpush.bf16.msra.mxu2 %v3683_v6 }
 0x153   :  { %2371 = vmatpush.bf16.msra.mxu3 %v3771_v62 }
 0x157   :  { %2372 = vmatpush.bf16.msra.mxu3 %v3763_v2 }
 0x15b   :  { %2373 = vmatpush.bf16.msra.mxu3 %v3755_v9 }
 0x15c   :  { %v1775_v43 = vpop.f32.mrf.mxu0 }
 0x15d   :  { %v1776_v47 = vadd.f32 %v1775_v43, %v1763_v49 }
 0x15e   :  { %v1788_v51 = vpop.f32.mrf.mxu1 }
 0x15f   :  { %vm1872_vm2 = vcmp.gt.f32.partialorder %v1776_v47, 0.0  ;;  %v1876_v52 = vmul.f32 0.2, %v1776_v47  ;;  %v1789_v10 = vadd.f32 %v1788_v51, %v356_v3  ;;  %2374 = vmatpush.bf16.msra.mxu3 %v3747_v28  ;;  %v4193_v51 = vld [vmem:[#allocation10 + $0x28] sm:$0xff] }
 0x161   :  { %v1880_v53 = vsel %vm1872_vm2, %v1776_v47, %v1876_v52  ;;  %v4195_v47 = vld [vmem:[#allocation10 + $0x38] sm:$0xff]  ;;  %v4192_v52 = vld [vmem:[#allocation10 + $0x20] sm:$0xff] }
 0x162   :  { %v1884_v55 = vpack.c.bf16 %v1880_v53, %v1880_v53  ;;  %2520 = vmatpush.bf16.msrb.mxu0 %v4195_v47  ;;  %v4203_v53 = vld [vmem:[#allocation10 + $0x78] sm:$0xff] }
 0x163   :  { %2533 = vmatpush.bf16.msrb.mxu1 %v4203_v53 }
 0x164   :  { %v1801_v63 = vpop.f32.mrf.mxu2  ;;  %2310 = vmatmul.bf16.vlgmr.msrb.gmra.mxu2 %v1884_v55  ;;  %v1777_v58 = vpop.f32.mrf.mxu0 }
 0x165   :  { %v1802_v33 = vadd.f32 %v1801_v63, %v1789_v10  ;;  %v4189_v63 = vld [vmem:[#allocation10 + $0x8] sm:$0xff]  ;;  %2618 = vmatpush.bf16.msrb.mxu2 %v4211_v0 }
 0x166   :  { %v1790_v21 = vpop.f32.mrf.mxu1  ;;  %2521 = vmatpush.bf16.msrb.mxu0 %v4194_v48 }
 0x167   :  { %v1814_v57 = vpop.f32.mrf.mxu3  ;;  %2534 = vmatpush.bf16.msrb.mxu1 %v4202_v54  ;;  %v4199_v21 = vld [vmem:[#allocation10 + $0x58] sm:$0xff] }
 0x168   :  { %v1815_v15 = vadd.f32 %v1814_v57, %v1802_v33  ;;  %v4201_v57 = vld [vmem:[#allocation10 + $0x68] sm:$0xff] }
 0x16a   :  { %2522 = vmatpush.bf16.msrb.mxu0 %v4193_v51 }
 0x16b   :  { %2535 = vmatpush.bf16.msrb.mxu1 %v4201_v57 }
 0x16c   :  { %v1803_v19 = vpop.f32.mrf.mxu2 }
 0x16d   :  { %v4210_v19 = vld [vmem:[#allocation11 + $0x30] sm:$0xff] }
 0x16e   :  { %2523 = vmatpush.bf16.msrb.mxu0 %v4192_v52  ;;  %2619 = vmatpush.bf16.msrb.mxu2 %v4210_v19 }
 0x16f   :  { %v1816_v1 = vpop.f32.mrf.mxu3  ;;  %2536 = vmatpush.bf16.msrb.mxu1 %v4200_v26 }
 0x172   :  { %2524 = vmatpush.bf16.msrb.mxu0 %v4191_v50 }
 0x173   :  { %2537 = vmatpush.bf16.msrb.mxu1 %v4199_v21 }
 0x174   :  { %2362 = vmatmul.bf16.vlgmr.msra.gmra.mxu2 %v1884_v55  ;;  %v4190_v55 = vld [vmem:[#allocation10 + $0x10] sm:$0xff] }
 0x176   :  { %2525 = vmatpush.bf16.msrb.mxu0 %v4190_v55 }
 0x177   :  { %2538 = vmatpush.bf16.msrb.mxu1 %v4198_v61 }
 0x17a   :  { %2526 = vmatpush.bf16.msrb.mxu0 %v4189_v63 }
 0x17b   :  { %2539 = vmatpush.bf16.msrb.mxu1 %v4197_v4 }
 0x17c   :  { %v1827_v16 = vpop.f32.mrf.mxu0 }
 0x17d   :  { %v1828_v18 = vadd.f32 %v1827_v16, %v1815_v15 }
 0x17e   :  { %v1840_v17 = vpop.f32.mrf.mxu1  ;;  %2527 = vmatpush.bf16.msrb.mxu0 %v4188_v59 }
 0x17f   :  { %v1841_v22 = vadd.f32 %v1840_v17, %v1828_v18  ;;  %2540 = vmatpush.bf16.msrb.mxu1 %v4196_v20  ;;  %v4209_v18 = vld [vmem:[#allocation11 + $0x28] sm:$0xff] }
 0x180   :  { %2620 = vmatpush.bf16.msrb.mxu2 %v4209_v18 }
 0x184   :  { %v1853_v35 = vpop.f32.mrf.mxu2  ;;  %v1829_v24 = vpop.f32.mrf.mxu0 }
 0x185   :  { %v1854_v23 = vadd.f32 %v1853_v35, %v1841_v22  ;;  %v1866_v12 = vpop.f32.mrf.mxu3  ;;  %v4208_v22 = vld [vmem:[#allocation11 + $0x20] sm:$0xff]  ;;  %v4207_v35 = vld [vmem:[#allocation11 + $0x18] sm:$0xff] }
 0x186   :  { %v1842_v8 = vpop.f32.mrf.mxu1  ;;  %2621 = vmatpush.bf16.msrb.mxu2 %v4208_v22  ;;  %v4204_v24 = vld [vmem:[#allocation11] sm:$0xff] }
 0x187   :  { %v1867_v25 = vadd.f32 %v1866_v12, %v1854_v23  ;;  %v4206_v23 = vld [vmem:[#allocation11 + $0x10] sm:$0xff]  ;;  %v4205_v12 = vld [vmem:[#allocation11 + $0x8] sm:$0xff] }
 0x189   :  { %vm1873_vm3 = vcmp.gt.f32.partialorder %v1867_v25, 0.0  ;;  %v1877_v27 = vmul.f32 0.2, %v1867_v25 }
 0x18a   :  { %2622 = vmatpush.bf16.msrb.mxu2 %v4207_v35 }
 0x18b   :  { %v1881_v44 = vsel %vm1873_vm3, %v1867_v25, %v1877_v27  ;;  %v4225_v27 = vld [vmem:[%s4592_s6] ss:$0 sm:$0xff] }
 0x18c   :  { %v1885_v29 = vpack.c.bf16 %v1881_v44, %v1881_v44  ;;  %v1855_v30 = vpop.f32.mrf.mxu2 }
 0x18d   :  { %v1868_v6 = vpop.f32.mrf.mxu3 }
 0x18e   :  { %2323 = vmatmul.bf16.vlgmr.msrb.gmra.mxu3 %v1885_v29  ;;  %2623 = vmatpush.bf16.msrb.mxu2 %v4206_v23 }
 0x192   :  { %2624 = vmatpush.bf16.msrb.mxu2 %v4205_v12 }
 0x196   :  { %2625 = vmatpush.bf16.msrb.mxu2 %v4204_v24 }
 0x19c   :  { %v2285_v31 = vpop.f32.mrf.mxu0 }
 0x19d   :  { %v2286_v40 = vadd.f32 %v2285_v31, %v1952_v34  ;;  %v4226_v34 = vld [vmem:[%s4594_s8] ss:$0 sm:$0xff] }
 0x19e   :  { %2375 = vmatmul.bf16.vlgmr.msra.gmra.mxu3 %v1885_v29 }
 0x1a4   :  { %v2287_v13 = vpop.f32.mrf.mxu0  ;;  %v2298_v36 = vpop.f32.mrf.mxu1 }
 0x1a5   :  { %v2299_v41 = vadd.f32 %v2298_v36, %v2286_v40 }
 0x1ac   :  { %v2300_v38 = vpop.f32.mrf.mxu1 }
 0x1bc   :  { %v2337_v37 = vpop.f32.mrf.mxu0 }
 0x1bd   :  { %v2338_v42 = vadd.f32 %v2337_v37, %v1953_v39 }
 0x1be   :  { %v2350_v49 = vpop.f32.mrf.mxu1 }
 0x1bf   :  { %v2351_v43 = vadd.f32 %v2350_v49, %v2338_v42 }
 0x1c4   :  { %v2339_v45 = vpop.f32.mrf.mxu0 }
 0x1c6   :  { %v2352_v46 = vpop.f32.mrf.mxu1 }
 0x1e7   :  { %v2311_v56 = vpop.f32.mrf.mxu2 }
 0x1e8   :  { %v2312_v1 = vadd.f32 %v2311_v56, %v2299_v41 }
 0x1ef   :  { %v2313_v58 = vpop.f32.mrf.mxu2 }
 0x1f7   :  { %v2363_v60 = vpop.f32.mrf.mxu2 }
 0x1f8   :  { %v2364_v33 = vadd.f32 %v2363_v60, %v2351_v43 }
 0x1ff   :  { %v2365_v62 = vpop.f32.mrf.mxu2 }
 0x211   :  { %v2324_v2 = vpop.f32.mrf.mxu3 }
 0x212   :  { %v2325_v3 = vadd.f32 %v2324_v2, %v2312_v1 }
 0x214   :  { %vm2380_vm4 = vcmp.gt.f32.partialorder %v2325_v3, 0.0  ;;  %v2382_v5 = vmul.f32 0.2, %v2325_v3 }
 0x216   :  { %v2384_v7 = vsel %vm2380_vm4, %v2325_v3, %v2382_v5 }
 0x217   :  { %v2386_v9 = vpack.c.bf16 %v2384_v7, %v2384_v7 }
 0x219   :  { %v2326_v10 = vpop.f32.mrf.mxu3  ;;  %2528 = vmatmul.bf16.vlgmr.msrb.gmra.mxu0 %v2386_v9 }
 0x221   :  { %v2376_v11 = vpop.f32.mrf.mxu3 }
 0x222   :  { %v2377_v14 = vadd.f32 %v2376_v11, %v2364_v33 }
 0x224   :  { %vm2381_vm5 = vcmp.gt.f32.partialorder %v2377_v14, 0.0  ;;  %v2383_v28 = vmul.f32 0.2, %v2377_v14 }
 0x226   :  { %v2385_v15 = vsel %vm2381_vm5, %v2377_v14, %v2383_v28 }
 0x227   :  { %v2387_v16 = vpack.c.bf16 %v2385_v15, %v2385_v15 }
 0x229   :  { %v2378_v17 = vpop.f32.mrf.mxu3  ;;  %2541 = vmatmul.bf16.vlgmr.msrb.gmra.mxu1 %v2387_v16 }
 0x296   :  { %v2529_v8 = vpop.f32.mrf.mxu0 }
 0x297   :  { %v2530_v44 = vadd.f32 %v4225_v27, %v2529_v8 }
 0x29e   :  { %v2531_v25 = vpop.f32.mrf.mxu0 }
 0x2a6   :  { %v2542_v29 = vpop.f32.mrf.mxu1 }
 0x2a7   :  { %v2543_v30 = vadd.f32 %v2542_v29, %v2530_v44 }
 0x2a9   :  { %vm2546_vm6 = vcmp.gt.f32.partialorder %v2543_v30, 0.0  ;;  %v2547_v6 = vmul.f32 0.2, %v2543_v30 }
 0x2ab   :  { %v2548_v31 = vsel %vm2546_vm6, %v2543_v30, %v2547_v6 }
 0x2ac   :  { %v2549_v32 = vpack.c.bf16 %v2548_v31, %v2548_v31 }
 0x2ae   :  { %v2544_v13 = vpop.f32.mrf.mxu1  ;;  %2626 = vmatmul.bf16.vlgmr.msrb.gmra.mxu2 %v2549_v32 }
 0x331   :  { %v2627_v40 = vpop.f32.mrf.mxu2 }
 0x332   :  { %v2628_v36 = vadd.f32 %v4226_v34, %v2627_v40 }
 0x334   :  { %2631 = vst [vmem:[#allocation13] sm:$0xff] %v2628_v36 }
 0x335   :  { %2642 = dma.vmem_to_hbm [thread:$0]  %s2638_s23, 128, %s2640_s26, [#allocation4]  }
 0x339   :  { %v2629_v41 = vpop.f32.mrf.mxu2 }
 0x33a   :  { %4403 = dma.done.wait [#allocation4], 128  }
 0x33b   :  { %4404 = vsyncadd [#allocation4], 4294967168 }
 0x33c   :  { %2647 = vsyncpa [#allocation3], 1 }
 0x33d   :  { %2648 = vsyncpa [#allocation6], 1 }
 0x33e   :  { %2649 = vsyncpa [#allocation9], 1 }
 0x33f   :  { %2650 = vsyncpa [#allocation12], 1 }
 0x340   :  { %2651 = vsyncpa [#allocation4], 1 }

</bundles_post_ra>
